<compile_context>
chip_gen: v6e
topology: v6e:2x2x1
jax: 0.10.0
libtpu: 0.0.40
codegen_flags: <defaults>
</compile_context>

<pallas_src>
import functools

import jax
import jax.numpy as jnp
from jax.experimental import pallas as pl
from jax.experimental.pallas import tpu as pltpu


# ----------------------------------------------------------------------------
# Conv kernel: KxK conv for one image.  The stride-s conv is expressed over the
# s*s "phase planes" of the padded input (space-to-batch), so every kernel tap
# is a contiguous (HO, WO, Cin) slice feeding one MXU matmul into a shared f32
# accumulator.  The kernel additionally emits per-image channel sum and
# sum-of-squares of the conv output for BatchNorm folding.
# ----------------------------------------------------------------------------
def _conv_bn_stats_kernel(x_ref, w_ref, o_ref, sum_ref, ssq_ref,
                          *, KH, KW, S, HO, WO):
    # x_ref  : (1, S*S, Lh, Lw, Cin)  phase-split padded input, one image
    # w_ref  : (KH, KW, Cin, Cout)
    # o_ref  : (1, HO*WO, Cout)       conv output (spatial flattened)
    # sum_ref: (1, 1, Cout)           sum over output positions
    # ssq_ref: (1, 1, Cout)           sum of squares over output positions
    cin = x_ref.shape[-1]
    cout = o_ref.shape[-1]
    acc = jnp.zeros((HO * WO, cout), jnp.float32)
    for i in range(KH):
        for j in range(KW):
            phase = (i % S) * S + (j % S)
            patch = x_ref[0, phase, pl.ds(i // S, HO), pl.ds(j // S, WO), :]
            acc = acc + jnp.dot(patch.reshape(HO * WO, cin), w_ref[i, j],
                                preferred_element_type=jnp.float32)
    o_ref[0] = acc
    sum_ref[0] = jnp.sum(acc, axis=0, keepdims=True)
    ssq_ref[0] = jnp.sum(acc * acc, axis=0, keepdims=True)


def conv2d_bn_stats(x, w, *, stride=1, padding=0):
    """NHWC conv, HWIO weights.  Returns (out, chan_sum, chan_sumsq) with
    out: (N, Ho*Wo, Cout), stats: (N, 1, Cout)."""
    n, h, wdt, cin = x.shape
    kh, kw, _, cout = w.shape
    if padding:
        # NOTE: halo materialized once in HBM; tiny next to activation traffic
        # at these shapes (could be over-fetched via BlockSpec for large images).
        x = jnp.pad(x, ((0, 0), (padding, padding), (padding, padding), (0, 0)))
    hp, wp = h + 2 * padding, wdt + 2 * padding
    ho = (hp - kh) // stride + 1
    wo = (wp - kw) // stride + 1
    s = stride
    if s == 1:
        xph = x[:, None]                               # (n, 1, hp, wp, cin)
        lh, lw = hp, wp
    else:
        # Space-to-batch phase split: stride-s taps become contiguous slices of
        # one of the s*s phase planes -> stride handled in-kernel, no 4x
        # overcompute/writeback and no strided vector loads.
        eh, ew = (-hp) % s, (-wp) % s
        if eh or ew:
            x = jnp.pad(x, ((0, 0), (0, eh), (0, ew), (0, 0)))
        lh, lw = (hp + eh) // s, (wp + ew) // s
        xph = x.reshape(n, lh, s, lw, s, cin)
        xph = jnp.transpose(xph, (0, 2, 4, 1, 3, 5)).reshape(n, s * s, lh, lw, cin)

    kern = functools.partial(_conv_bn_stats_kernel,
                             KH=kh, KW=kw, S=s, HO=ho, WO=wo)
    return pl.pallas_call(
        kern,
        out_shape=(jax.ShapeDtypeStruct((n, ho * wo, cout), jnp.float32),
                   jax.ShapeDtypeStruct((n, 1, cout), jnp.float32),
                   jax.ShapeDtypeStruct((n, 1, cout), jnp.float32)),
        grid=(n,),
        in_specs=[
            pl.BlockSpec((1, s * s, lh, lw, cin), lambda b: (b, 0, 0, 0, 0)),
            pl.BlockSpec((kh, kw, cin, cout), lambda b: (0, 0, 0, 0)),
        ],
        out_specs=(
            pl.BlockSpec((1, ho * wo, cout), lambda b: (b, 0, 0)),
            pl.BlockSpec((1, 1, cout), lambda b: (b, 0, 0)),
            pl.BlockSpec((1, 1, cout), lambda b: (b, 0, 0)),
        ),
        compiler_params=pltpu.CompilerParams(dimension_semantics=("parallel",)),
    )(xph, w)


# ----------------------------------------------------------------------------
# BatchNorm folding from kernel-emitted statistics (training-mode forward:
# batch statistics, biased variance) -> per-channel scale/bias.
# ----------------------------------------------------------------------------
def bn_fold_from_stats(chan_sum, chan_ssq, count, gamma, beta, eps=1e-5):
    mean = jnp.sum(chan_sum, axis=(0, 1)) / count
    var = jnp.sum(chan_ssq, axis=(0, 1)) / count - mean * mean
    scale = gamma / jnp.sqrt(var + eps)
    bias = beta - mean * scale
    return scale, bias


# ----------------------------------------------------------------------------
# Lane-dense elementwise epilogues.  Activations are flattened to (rows, lanes)
# with lanes a multiple of the channel count (grown toward 128), and the
# per-channel vectors are tiled across the lane width -> dense vector stores.
# ----------------------------------------------------------------------------
def _scale_bias_relu_kernel(x_ref, s_ref, b_ref, o_ref):
    o_ref[...] = jnp.maximum(x_ref[...] * s_ref[...] + b_ref[...], 0.0)


def _bn_add_bn_relu_kernel(a_ref, r_ref, sa_ref, ba_ref, sr_ref, br_ref, o_ref):
    main = a_ref[...] * sa_ref[...] + ba_ref[...]
    short = r_ref[...] * sr_ref[...] + br_ref[...]
    o_ref[...] = jnp.maximum(main + short, 0.0)


def _bn_add_relu_kernel(a_ref, r_ref, sa_ref, ba_ref, o_ref):
    o_ref[...] = jnp.maximum(a_ref[...] * sa_ref[...] + ba_ref[...] + r_ref[...], 0.0)


def _lane_dense_shape(total, c):
    lanes = c
    while lanes < 128 and total % (lanes * 2) == 0:
        lanes *= 2
    return total // lanes, lanes


def _row_block(rows):
    return 256 if (rows > 256 and rows % 256 == 0) else rows


def _tile_channel_vec(v, lanes):
    return jnp.tile(v, lanes // v.shape[0]).reshape(1, lanes)


def _elementwise_call(kernel, arrays, chan_vecs, c, out_shape):
    """Run `kernel` over a lane-dense 2D flattening of `arrays` (all the same
    size, channels-last order) with per-channel vectors tiled to the lane
    width.  The first array is aliased with the output (in-place update)."""
    total = arrays[0].size
    rows, lanes = _lane_dense_shape(total, c)
    br = _row_block(rows)
    flat = [a.reshape(rows, lanes) for a in arrays]
    vecs = [_tile_channel_vec(v, lanes) for v in chan_vecs]
    arr_spec = pl.BlockSpec((br, lanes), lambda i: (i, 0))
    vec_spec = pl.BlockSpec((1, lanes), lambda i: (0, 0))
    y = pl.pallas_call(
        kernel,
        out_shape=jax.ShapeDtypeStruct((rows, lanes), jnp.float32),
        grid=(rows // br,),
        in_specs=[arr_spec] * len(flat) + [vec_spec] * len(vecs),
        out_specs=arr_spec,
        input_output_aliases={0: 0},
        compiler_params=pltpu.CompilerParams(dimension_semantics=("parallel",)),
    )(*flat, *vecs)
    return y.reshape(out_shape)


# ----------------------------------------------------------------------------
# BasicBlock
# ----------------------------------------------------------------------------
class BasicBlockPallas:
    expansion = 1

    def __init__(self, in_planes, planes, stride=1, *, key):
        k1, k2, k3 = jax.random.split(key, 3)
        self.in_planes = in_planes
        self.planes = planes
        self.stride = stride
        # conv weights in HWIO layout
        self.w1 = 0.1 * jax.random.normal(k1, (3, 3, in_planes, planes), jnp.float32)
        self.w2 = 0.1 * jax.random.normal(k2, (3, 3, planes, planes), jnp.float32)
        self.g1 = jnp.ones((planes,), jnp.float32)   # BatchNorm2d default init
        self.b1 = jnp.zeros((planes,), jnp.float32)
        self.g2 = jnp.ones((planes,), jnp.float32)
        self.b2 = jnp.zeros((planes,), jnp.float32)
        self.has_shortcut = (stride != 1) or (in_planes != self.expansion * planes)
        if self.has_shortcut:
            self.wsc = 0.1 * jax.random.normal(
                k3, (1, 1, in_planes, self.expansion * planes), jnp.float32)
            self.gsc = jnp.ones((self.expansion * planes,), jnp.float32)
            self.bsc = jnp.zeros((self.expansion * planes,), jnp.float32)

    def __call__(self, x_nchw):
        x = jnp.transpose(x_nchw, (0, 2, 3, 1)).astype(jnp.float32)  # NCHW->NHWC
        n, h, w, _ = x.shape
        s = self.stride
        planes = self.planes
        ho = (h + 2 - 3) // s + 1
        wo = (w + 2 - 3) // s + 1
        count = n * ho * wo

        # conv1 (3x3, stride s, pad 1) + bn1 (batch stats) + relu
        out1, c1s, c1q = conv2d_bn_stats(x, self.w1, stride=s, padding=1)
        sc1, bi1 = bn_fold_from_stats(c1s, c1q, count, self.g1, self.b1)
        act1 = _elementwise_call(_scale_bias_relu_kernel, [out1], [sc1, bi1],
                                 planes, (n, ho, wo, planes))

        # conv2 (3x3, stride 1, pad 1) + bn2
        out2, c2s, c2q = conv2d_bn_stats(act1, self.w2, stride=1, padding=1)
        sc2, bi2 = bn_fold_from_stats(c2s, c2q, count, self.g2, self.b2)

        if self.has_shortcut:
            # 1x1 stride-s conv == 1x1 conv on the subsampled input (exact).
            xs = x[:, ::s, ::s, :] if s > 1 else x
            outs, css, csq = conv2d_bn_stats(xs, self.wsc, stride=1, padding=0)
            scs, bis = bn_fold_from_stats(css, csq, count, self.gsc, self.bsc)
            y = _elementwise_call(_bn_add_bn_relu_kernel, [out2, outs],
                                  [sc2, bi2, scs, bis], planes,
                                  (n, ho, wo, planes))
        else:
            # identity shortcut: plain residual add + relu (no dummy BN)
            y = _elementwise_call(_bn_add_relu_kernel, [out2, x],
                                  [sc2, bi2], planes, (n, ho, wo, planes))

        return jnp.transpose(y, (0, 3, 1, 2))  # NHWC -> NCHW


# ----------------------------------------------------------------------------
# Pure-JAX reference (same math, XLA convs) for verification.
# ----------------------------------------------------------------------------
def reference_forward(block, x_nchw):
    x = jnp.transpose(x_nchw, (0, 2, 3, 1)).astype(jnp.float32)

    def conv(inp, w, stride, pad):
        return jax.lax.conv_general_dilated(
            inp, w, (stride, stride), [(pad, pad), (pad, pad)],
            dimension_numbers=("NHWC", "HWIO", "NHWC"))

    def bn(inp, g, b, eps=1e-5):
        m = inp.mean((0, 1, 2))
        v = ((inp - m) ** 2).mean((0, 1, 2))
        return (inp - m) / jnp.sqrt(v + eps) * g + b

    out = jax.nn.relu(bn(conv(x, block.w1, block.stride, 1), block.g1, block.b1))
    out = bn(conv(out, block.w2, 1, 1), block.g2, block.b2)
    if block.has_shortcut:
        short = bn(conv(x, block.wsc, block.stride, 0), block.gsc, block.bsc)
    else:
        short = x
    out = jax.nn.relu(out + short)
    return jnp.transpose(out, (0, 3, 1, 2))


if __name__ == "__main__":
    key = jax.random.PRNGKey(0)
    kx, kb1, kb2 = jax.random.split(key, 3)
    x = jax.random.normal(kx, (2, 4, 16, 16), jnp.float32)  # NCHW, like PyTorch

    # Case 1: downsampling block with 1x1-conv shortcut (in=4, planes=8, stride=2)
    blk_down = BasicBlockPallas(4, 8, stride=2, key=kb1)
    y_down = jax.block_until_ready(jax.jit(blk_down.__call__)(x))
    r_down = reference_forward(blk_down, x)
    assert y_down.shape == (2, 8, 8, 8), y_down.shape
    assert jnp.allclose(y_down, r_down, atol=1e-3, rtol=1e-3), "downsample block mismatch"

    # Case 2: identity-shortcut block (in=planes=4, stride=1)
    blk_id = BasicBlockPallas(4, 4, stride=1, key=kb2)
    y_id = jax.block_until_ready(jax.jit(blk_id.__call__)(x))
    r_id = reference_forward(blk_id, x)
    assert y_id.shape == (2, 4, 16, 16), y_id.shape
    assert jnp.allclose(y_id, r_id, atol=1e-3, rtol=1e-3), "identity block mismatch"

    print("KERNEL_OK")
</pallas_src>

<mosaic_0001>
module attributes {stable_mosaic.version = 11 : i64} {
  func.func @_conv_bn_stats_kernel(%arg0: i32, %arg1: memref<1x4x9x9x4xf32, #tpu.memory_space<vmem>>, %arg2: memref<3x3x4x8xf32, #tpu.memory_space<vmem>>, %arg3: memref<1x64x8xf32, #tpu.memory_space<vmem>>, %arg4: memref<1x1x8xf32, #tpu.memory_space<vmem>>, %arg5: memref<1x1x8xf32, #tpu.memory_space<vmem>>) attributes {dimension_semantics = [#tpu.dimension_semantics<parallel>], iteration_bounds = array<i64: 2>, scalar_prefetch = 0 : i64, scratch_operands = 0 : i64, tpu.core_type = #tpu.core_type<tc>, window_params = [{transform_indices = @transform_0, window_bounds = array<i64: 1, 4, 9, 9, 4>}, {pipeline_mode = #tpu.pipeline_mode<synchronous>, transform_indices = @transform_1, window_bounds = array<i64: 3, 3, 4, 8>}, {transform_indices = @transform_2, window_bounds = array<i64: 1, 64, 8>}, {transform_indices = @transform_3, window_bounds = array<i64: 1, 1, 8>}, {transform_indices = @transform_4, window_bounds = array<i64: 1, 1, 8>}]} {
    %cst = arith.constant 0.000000e+00 : f32
    %0 = vector.broadcast %cst : f32 to vector<64x8xf32>
    %c0 = arith.constant 0 : index
    %c0_0 = arith.constant 0 : index
    %c0_1 = arith.constant 0 : index
    %c0_2 = arith.constant 0 : index
    %c0_3 = arith.constant 0 : index
    %1 = vector.load %arg1[%c0, %c0_0, %c0_1, %c0_2, %c0_3] : memref<1x4x9x9x4xf32, #tpu.memory_space<vmem>>, vector<1x1x8x8x4xf32>
    %2 = vector.shape_cast %1 : vector<1x1x8x8x4xf32> to vector<8x8x4xf32>
    %3 = vector.shape_cast %2 : vector<8x8x4xf32> to vector<64x4xf32>
    %c0_4 = arith.constant 0 : index
    %c0_5 = arith.constant 0 : index
    %c0_6 = arith.constant 0 : index
    %c0_7 = arith.constant 0 : index
    %4 = vector.load %arg2[%c0_4, %c0_5, %c0_6, %c0_7] : memref<3x3x4x8xf32, #tpu.memory_space<vmem>>, vector<1x1x4x8xf32>
    %5 = vector.shape_cast %4 : vector<1x1x4x8xf32> to vector<4x8xf32>
    %cst_8 = arith.constant dense<0.000000e+00> : vector<64x8xf32>
    %6 = tpu.matmul %3, %5, %cst_8 {dimension_numbers = #tpu.dot_dimension_numbers<[1], [0], [0], [1], [0, 0, 1, 1], [], []>} : vector<64x4xf32>, vector<4x8xf32>, vector<64x8xf32> -> vector<64x8xf32>
    %7 = arith.addf %0, %6 : vector<64x8xf32>
    %c0_9 = arith.constant 0 : index
    %c1 = arith.constant 1 : index
    %c0_10 = arith.constant 0 : index
    %c0_11 = arith.constant 0 : index
    %c0_12 = arith.constant 0 : index
    %8 = vector.load %arg1[%c0_9, %c1, %c0_10, %c0_11, %c0_12] : memref<1x4x9x9x4xf32, #tpu.memory_space<vmem>>, vector<1x1x8x8x4xf32>
    %9 = vector.shape_cast %8 : vector<1x1x8x8x4xf32> to vector<8x8x4xf32>
    %10 = vector.shape_cast %9 : vector<8x8x4xf32> to vector<64x4xf32>
    %c0_13 = arith.constant 0 : index
    %c1_14 = arith.constant 1 : index
    %c0_15 = arith.constant 0 : index
    %c0_16 = arith.constant 0 : index
    %11 = vector.load %arg2[%c0_13, %c1_14, %c0_15, %c0_16] : memref<3x3x4x8xf32, #tpu.memory_space<vmem>>, vector<1x1x4x8xf32>
    %12 = vector.shape_cast %11 : vector<1x1x4x8xf32> to vector<4x8xf32>
    %cst_17 = arith.constant dense<0.000000e+00> : vector<64x8xf32>
    %13 = tpu.matmul %10, %12, %cst_17 {dimension_numbers = #tpu.dot_dimension_numbers<[1], [0], [0], [1], [0, 0, 1, 1], [], []>} : vector<64x4xf32>, vector<4x8xf32>, vector<64x8xf32> -> vector<64x8xf32>
    %14 = arith.addf %7, %13 : vector<64x8xf32>
    %c0_18 = arith.constant 0 : index
    %c0_19 = arith.constant 0 : index
    %c0_20 = arith.constant 0 : index
    %c1_21 = arith.constant 1 : index
    %c0_22 = arith.constant 0 : index
    %15 = vector.load %arg1[%c0_18, %c0_19, %c0_20, %c1_21, %c0_22] : memref<1x4x9x9x4xf32, #tpu.memory_space<vmem>>, vector<1x1x8x8x4xf32>
    %16 = vector.shape_cast %15 : vector<1x1x8x8x4xf32> to vector<8x8x4xf32>
    %17 = vector.shape_cast %16 : vector<8x8x4xf32> to vector<64x4xf32>
    %c0_23 = arith.constant 0 : index
    %c2 = arith.constant 2 : index
    %c0_24 = arith.constant 0 : index
    %c0_25 = arith.constant 0 : index
    %18 = vector.load %arg2[%c0_23, %c2, %c0_24, %c0_25] : memref<3x3x4x8xf32, #tpu.memory_space<vmem>>, vector<1x1x4x8xf32>
    %19 = vector.shape_cast %18 : vector<1x1x4x8xf32> to vector<4x8xf32>
    %cst_26 = arith.constant dense<0.000000e+00> : vector<64x8xf32>
    %20 = tpu.matmul %17, %19, %cst_26 {dimension_numbers = #tpu.dot_dimension_numbers<[1], [0], [0], [1], [0, 0, 1, 1], [], []>} : vector<64x4xf32>, vector<4x8xf32>, vector<64x8xf32> -> vector<64x8xf32>
    %21 = arith.addf %14, %20 : vector<64x8xf32>
    %c0_27 = arith.constant 0 : index
    %c2_28 = arith.constant 2 : index
    %c0_29 = arith.constant 0 : index
    %c0_30 = arith.constant 0 : index
    %c0_31 = arith.constant 0 : index
    %22 = vector.load %arg1[%c0_27, %c2_28, %c0_29, %c0_30, %c0_31] : memref<1x4x9x9x4xf32, #tpu.memory_space<vmem>>, vector<1x1x8x8x4xf32>
    %23 = vector.shape_cast %22 : vector<1x1x8x8x4xf32> to vector<8x8x4xf32>
    %24 = vector.shape_cast %23 : vector<8x8x4xf32> to vector<64x4xf32>
    %c1_32 = arith.constant 1 : index
    %c0_33 = arith.constant 0 : index
    %c0_34 = arith.constant 0 : index
    %c0_35 = arith.constant 0 : index
    %25 = vector.load %arg2[%c1_32, %c0_33, %c0_34, %c0_35] : memref<3x3x4x8xf32, #tpu.memory_space<vmem>>, vector<1x1x4x8xf32>
    %26 = vector.shape_cast %25 : vector<1x1x4x8xf32> to vector<4x8xf32>
    %cst_36 = arith.constant dense<0.000000e+00> : vector<64x8xf32>
    %27 = tpu.matmul %24, %26, %cst_36 {dimension_numbers = #tpu.dot_dimension_numbers<[1], [0], [0], [1], [0, 0, 1, 1], [], []>} : vector<64x4xf32>, vector<4x8xf32>, vector<64x8xf32> -> vector<64x8xf32>
    %28 = arith.addf %21, %27 : vector<64x8xf32>
    %c0_37 = arith.constant 0 : index
    %c3 = arith.constant 3 : index
    %c0_38 = arith.constant 0 : index
    %c0_39 = arith.constant 0 : index
    %c0_40 = arith.constant 0 : index
    %29 = vector.load %arg1[%c0_37, %c3, %c0_38, %c0_39, %c0_40] : memref<1x4x9x9x4xf32, #tpu.memory_space<vmem>>, vector<1x1x8x8x4xf32>
    %30 = vector.shape_cast %29 : vector<1x1x8x8x4xf32> to vector<8x8x4xf32>
    %31 = vector.shape_cast %30 : vector<8x8x4xf32> to vector<64x4xf32>
    %c1_41 = arith.constant 1 : index
    %c1_42 = arith.constant 1 : index
    %c0_43 = arith.constant 0 : index
    %c0_44 = arith.constant 0 : index
    %32 = vector.load %arg2[%c1_41, %c1_42, %c0_43, %c0_44] : memref<3x3x4x8xf32, #tpu.memory_space<vmem>>, vector<1x1x4x8xf32>
    %33 = vector.shape_cast %32 : vector<1x1x4x8xf32> to vector<4x8xf32>
    %cst_45 = arith.constant dense<0.000000e+00> : vector<64x8xf32>
    %34 = tpu.matmul %31, %33, %cst_45 {dimension_numbers = #tpu.dot_dimension_numbers<[1], [0], [0], [1], [0, 0, 1, 1], [], []>} : vector<64x4xf32>, vector<4x8xf32>, vector<64x8xf32> -> vector<64x8xf32>
    %35 = arith.addf %28, %34 : vector<64x8xf32>
    %c0_46 = arith.constant 0 : index
    %c2_47 = arith.constant 2 : index
    %c0_48 = arith.constant 0 : index
    %c1_49 = arith.constant 1 : index
    %c0_50 = arith.constant 0 : index
    %36 = vector.load %arg1[%c0_46, %c2_47, %c0_48, %c1_49, %c0_50] : memref<1x4x9x9x4xf32, #tpu.memory_space<vmem>>, vector<1x1x8x8x4xf32>
    %37 = vector.shape_cast %36 : vector<1x1x8x8x4xf32> to vector<8x8x4xf32>
    %38 = vector.shape_cast %37 : vector<8x8x4xf32> to vector<64x4xf32>
    %c1_51 = arith.constant 1 : index
    %c2_52 = arith.constant 2 : index
    %c0_53 = arith.constant 0 : index
    %c0_54 = arith.constant 0 : index
    %39 = vector.load %arg2[%c1_51, %c2_52, %c0_53, %c0_54] : memref<3x3x4x8xf32, #tpu.memory_space<vmem>>, vector<1x1x4x8xf32>
    %40 = vector.shape_cast %39 : vector<1x1x4x8xf32> to vector<4x8xf32>
    %cst_55 = arith.constant dense<0.000000e+00> : vector<64x8xf32>
    %41 = tpu.matmul %38, %40, %cst_55 {dimension_numbers = #tpu.dot_dimension_numbers<[1], [0], [0], [1], [0, 0, 1, 1], [], []>} : vector<64x4xf32>, vector<4x8xf32>, vector<64x8xf32> -> vector<64x8xf32>
    %42 = arith.addf %35, %41 : vector<64x8xf32>
    %c0_56 = arith.constant 0 : index
    %c0_57 = arith.constant 0 : index
    %c1_58 = arith.constant 1 : index
    %c0_59 = arith.constant 0 : index
    %c0_60 = arith.constant 0 : index
    %43 = vector.load %arg1[%c0_56, %c0_57, %c1_58, %c0_59, %c0_60] : memref<1x4x9x9x4xf32, #tpu.memory_space<vmem>>, vector<1x1x8x8x4xf32>
    %44 = vector.shape_cast %43 : vector<1x1x8x8x4xf32> to vector<8x8x4xf32>
    %45 = vector.shape_cast %44 : vector<8x8x4xf32> to vector<64x4xf32>
    %c2_61 = arith.constant 2 : index
    %c0_62 = arith.constant 0 : index
    %c0_63 = arith.constant 0 : index
    %c0_64 = arith.constant 0 : index
    %46 = vector.load %arg2[%c2_61, %c0_62, %c0_63, %c0_64] : memref<3x3x4x8xf32, #tpu.memory_space<vmem>>, vector<1x1x4x8xf32>
    %47 = vector.shape_cast %46 : vector<1x1x4x8xf32> to vector<4x8xf32>
    %cst_65 = arith.constant dense<0.000000e+00> : vector<64x8xf32>
    %48 = tpu.matmul %45, %47, %cst_65 {dimension_numbers = #tpu.dot_dimension_numbers<[1], [0], [0], [1], [0, 0, 1, 1], [], []>} : vector<64x4xf32>, vector<4x8xf32>, vector<64x8xf32> -> vector<64x8xf32>
    %49 = arith.addf %42, %48 : vector<64x8xf32>
    %c0_66 = arith.constant 0 : index
    %c1_67 = arith.constant 1 : index
    %c1_68 = arith.constant 1 : index
    %c0_69 = arith.constant 0 : index
    %c0_70 = arith.constant 0 : index
    %50 = vector.load %arg1[%c0_66, %c1_67, %c1_68, %c0_69, %c0_70] : memref<1x4x9x9x4xf32, #tpu.memory_space<vmem>>, vector<1x1x8x8x4xf32>
    %51 = vector.shape_cast %50 : vector<1x1x8x8x4xf32> to vector<8x8x4xf32>
    %52 = vector.shape_cast %51 : vector<8x8x4xf32> to vector<64x4xf32>
    %c2_71 = arith.constant 2 : index
    %c1_72 = arith.constant 1 : index
    %c0_73 = arith.constant 0 : index
    %c0_74 = arith.constant 0 : index
    %53 = vector.load %arg2[%c2_71, %c1_72, %c0_73, %c0_74] : memref<3x3x4x8xf32, #tpu.memory_space<vmem>>, vector<1x1x4x8xf32>
    %54 = vector.shape_cast %53 : vector<1x1x4x8xf32> to vector<4x8xf32>
    %cst_75 = arith.constant dense<0.000000e+00> : vector<64x8xf32>
    %55 = tpu.matmul %52, %54, %cst_75 {dimension_numbers = #tpu.dot_dimension_numbers<[1], [0], [0], [1], [0, 0, 1, 1], [], []>} : vector<64x4xf32>, vector<4x8xf32>, vector<64x8xf32> -> vector<64x8xf32>
    %56 = arith.addf %49, %55 : vector<64x8xf32>
    %c0_76 = arith.constant 0 : index
    %c0_77 = arith.constant 0 : index
    %c1_78 = arith.constant 1 : index
    %c1_79 = arith.constant 1 : index
    %c0_80 = arith.constant 0 : index
    %57 = vector.load %arg1[%c0_76, %c0_77, %c1_78, %c1_79, %c0_80] : memref<1x4x9x9x4xf32, #tpu.memory_space<vmem>>, vector<1x1x8x8x4xf32>
    %58 = vector.shape_cast %57 : vector<1x1x8x8x4xf32> to vector<8x8x4xf32>
    %59 = vector.shape_cast %58 : vector<8x8x4xf32> to vector<64x4xf32>
    %c2_81 = arith.constant 2 : index
    %c2_82 = arith.constant 2 : index
    %c0_83 = arith.constant 0 : index
    %c0_84 = arith.constant 0 : index
    %60 = vector.load %arg2[%c2_81, %c2_82, %c0_83, %c0_84] : memref<3x3x4x8xf32, #tpu.memory_space<vmem>>, vector<1x1x4x8xf32>
    %61 = vector.shape_cast %60 : vector<1x1x4x8xf32> to vector<4x8xf32>
    %cst_85 = arith.constant dense<0.000000e+00> : vector<64x8xf32>
    %62 = tpu.matmul %59, %61, %cst_85 {dimension_numbers = #tpu.dot_dimension_numbers<[1], [0], [0], [1], [0, 0, 1, 1], [], []>} : vector<64x4xf32>, vector<4x8xf32>, vector<64x8xf32> -> vector<64x8xf32>
    %63 = arith.addf %56, %62 : vector<64x8xf32>
    %c0_86 = arith.constant 0 : index
    %c0_87 = arith.constant 0 : index
    %c0_88 = arith.constant 0 : index
    %64 = vector.load %arg3[%c0_86, %c0_87, %c0_88] : memref<1x64x8xf32, #tpu.memory_space<vmem>>, vector<1x64x8xf32>
    %65 = vector.shape_cast %64 : vector<1x64x8xf32> to vector<64x8xf32>
    %66 = vector.shape_cast %63 : vector<64x8xf32> to vector<1x64x8xf32>
    tpu.vector_store %arg3[%c0_86, %c0_87, %c0_88], %66 {strides = array<i32>} : memref<1x64x8xf32, #tpu.memory_space<vmem>>, vector<1x64x8xf32>,
    %cst_89 = arith.constant dense<0.000000e+00> : vector<8xf32>
    %67 = vector.multi_reduction <add>, %63, %cst_89 [0] : vector<64x8xf32> to vector<8xf32>
    %68 = vector.shape_cast %67 : vector<8xf32> to vector<1x8xf32>
    %c0_90 = arith.constant 0 : index
    %c0_91 = arith.constant 0 : index
    %c0_92 = arith.constant 0 : index
    %69 = vector.load %arg4[%c0_90, %c0_91, %c0_92] : memref<1x1x8xf32, #tpu.memory_space<vmem>>, vector<1x1x8xf32>
    %70 = vector.shape_cast %69 : vector<1x1x8xf32> to vector<1x8xf32>
    %71 = vector.shape_cast %68 : vector<1x8xf32> to vector<1x1x8xf32>
    tpu.vector_store %arg4[%c0_90, %c0_91, %c0_92], %71 {strides = array<i32>} : memref<1x1x8xf32, #tpu.memory_space<vmem>>, vector<1x1x8xf32>,
    %72 = arith.mulf %63, %63 : vector<64x8xf32>
    %cst_93 = arith.constant dense<0.000000e+00> : vector<8xf32>
    %73 = vector.multi_reduction <add>, %72, %cst_93 [0] : vector<64x8xf32> to vector<8xf32>
    %74 = vector.shape_cast %73 : vector<8xf32> to vector<1x8xf32>
    %c0_94 = arith.constant 0 : index
    %c0_95 = arith.constant 0 : index
    %c0_96 = arith.constant 0 : index
    %75 = vector.load %arg5[%c0_94, %c0_95, %c0_96] : memref<1x1x8xf32, #tpu.memory_space<vmem>>, vector<1x1x8xf32>
    %76 = vector.shape_cast %75 : vector<1x1x8xf32> to vector<1x8xf32>
    %77 = vector.shape_cast %74 : vector<1x8xf32> to vector<1x1x8xf32>
    tpu.vector_store %arg5[%c0_94, %c0_95, %c0_96], %77 {strides = array<i32>} : memref<1x1x8xf32, #tpu.memory_space<vmem>>, vector<1x1x8xf32>,
    return
  }
  func.func @transform_0(%arg0: i32) -> (i32, i32, i32, i32, i32) {
    %c0_i32 = arith.constant 0 : i32
    %c0_i32_0 = arith.constant 0 : i32
    %c0_i32_1 = arith.constant 0 : i32
    %c0_i32_2 = arith.constant 0 : i32
    %c0_i32_3 = arith.constant 0 : i32
    return %arg0, %c0_i32, %c0_i32_0, %c0_i32_1, %c0_i32_2 : i32, i32, i32, i32, i32
  }
  func.func @transform_1(%arg0: i32) -> (i32, i32, i32, i32) {
    %c0_i32 = arith.constant 0 : i32
    %c0_i32_0 = arith.constant 0 : i32
    %c0_i32_1 = arith.constant 0 : i32
    %c0_i32_2 = arith.constant 0 : i32
    %c0_i32_3 = arith.constant 0 : i32
    return %c0_i32, %c0_i32_0, %c0_i32_1, %c0_i32_2 : i32, i32, i32, i32
  }
  func.func @transform_2(%arg0: i32) -> (i32, i32, i32) {
    %c0_i32 = arith.constant 0 : i32
    %c0_i32_0 = arith.constant 0 : i32
    %c0_i32_1 = arith.constant 0 : i32
    return %arg0, %c0_i32, %c0_i32_0 : i32, i32, i32
  }
  func.func @transform_3(%arg0: i32) -> (i32, i32, i32) {
    %c0_i32 = arith.constant 0 : i32
    %c0_i32_0 = arith.constant 0 : i32
    %c0_i32_1 = arith.constant 0 : i32
    return %arg0, %c0_i32, %c0_i32_0 : i32, i32, i32
  }
  func.func @transform_4(%arg0: i32) -> (i32, i32, i32) {
    %c0_i32 = arith.constant 0 : i32
    %c0_i32_0 = arith.constant 0 : i32
    %c0_i32_1 = arith.constant 0 : i32
    return %arg0, %c0_i32, %c0_i32_0 : i32, i32, i32
  }
}

module attributes {stable_mosaic.version = 11 : i64} {
  func.func @_scale_bias_relu_kernel(%arg0: i32, %arg1: memref<8x128xf32, #tpu.memory_space<vmem>>, %arg2: memref<1x128xf32, #tpu.memory_space<vmem>>, %arg3: memref<1x128xf32, #tpu.memory_space<vmem>>, %arg4: memref<8x128xf32, #tpu.memory_space<vmem>>) attributes {dimension_semantics = [#tpu.dimension_semantics<parallel>], iteration_bounds = array<i64: 1>, scalar_prefetch = 0 : i64, scratch_operands = 0 : i64, tpu.core_type = #tpu.core_type<tc>, window_params = [{transform_indices = @transform_0, window_bounds = array<i64: 8, 128>}, {pipeline_mode = #tpu.pipeline_mode<synchronous>, transform_indices = @transform_1, window_bounds = array<i64: 1, 128>}, {pipeline_mode = #tpu.pipeline_mode<synchronous>, transform_indices = @transform_2, window_bounds = array<i64: 1, 128>}, {transform_indices = @transform_3, window_bounds = array<i64: 8, 128>}]} {
    %c0 = arith.constant 0 : index
    %c0_0 = arith.constant 0 : index
    %0 = vector.load %arg1[%c0, %c0_0] : memref<8x128xf32, #tpu.memory_space<vmem>>, vector<8x128xf32>
    %c0_1 = arith.constant 0 : index
    %c0_2 = arith.constant 0 : index
    %1 = vector.load %arg2[%c0_1, %c0_2] : memref<1x128xf32, #tpu.memory_space<vmem>>, vector<1x128xf32>
    %2 = vector.broadcast %1 : vector<1x128xf32> to vector<8x128xf32>
    %3 = arith.mulf %0, %2 : vector<8x128xf32>
    %c0_3 = arith.constant 0 : index
    %c0_4 = arith.constant 0 : index
    %4 = vector.load %arg3[%c0_3, %c0_4] : memref<1x128xf32, #tpu.memory_space<vmem>>, vector<1x128xf32>
    %5 = vector.broadcast %4 : vector<1x128xf32> to vector<8x128xf32>
    %6 = arith.addf %3, %5 : vector<8x128xf32>
    %cst = arith.constant 0.000000e+00 : f32
    %7 = vector.broadcast %cst : f32 to vector<8x128xf32>
    %8 = arith.maximumf %6, %7 : vector<8x128xf32>
    %c0_5 = arith.constant 0 : index
    %c0_6 = arith.constant 0 : index
    %9 = vector.load %arg4[%c0_5, %c0_6] : memref<8x128xf32, #tpu.memory_space<vmem>>, vector<8x128xf32>
    tpu.vector_store %arg4[%c0_5, %c0_6], %8 {strides = array<i32>} : memref<8x128xf32, #tpu.memory_space<vmem>>, vector<8x128xf32>,
    return
  }
  func.func @transform_0(%arg0: i32) -> (i32, i32) {
    %c0_i32 = arith.constant 0 : i32
    %c0_i32_0 = arith.constant 0 : i32
    return %arg0, %c0_i32 : i32, i32
  }
  func.func @transform_1(%arg0: i32) -> (i32, i32) {
    %c0_i32 = arith.constant 0 : i32
    %c0_i32_0 = arith.constant 0 : i32
    %c0_i32_1 = arith.constant 0 : i32
    return %c0_i32, %c0_i32_0 : i32, i32
  }
  func.func @transform_2(%arg0: i32) -> (i32, i32) {
    %c0_i32 = arith.constant 0 : i32
    %c0_i32_0 = arith.constant 0 : i32
    %c0_i32_1 = arith.constant 0 : i32
    return %c0_i32, %c0_i32_0 : i32, i32
  }
  func.func @transform_3(%arg0: i32) -> (i32, i32) {
    %c0_i32 = arith.constant 0 : i32
    %c0_i32_0 = arith.constant 0 : i32
    return %arg0, %c0_i32 : i32, i32
  }
}

module attributes {stable_mosaic.version = 11 : i64} {
  func.func @_conv_bn_stats_kernel(%arg0: i32, %arg1: memref<1x1x10x10x8xf32, #tpu.memory_space<vmem>>, %arg2: memref<3x3x8x8xf32, #tpu.memory_space<vmem>>, %arg3: memref<1x64x8xf32, #tpu.memory_space<vmem>>, %arg4: memref<1x1x8xf32, #tpu.memory_space<vmem>>, %arg5: memref<1x1x8xf32, #tpu.memory_space<vmem>>) attributes {dimension_semantics = [#tpu.dimension_semantics<parallel>], iteration_bounds = array<i64: 2>, scalar_prefetch = 0 : i64, scratch_operands = 0 : i64, tpu.core_type = #tpu.core_type<tc>, window_params = [{transform_indices = @transform_0, window_bounds = array<i64: 1, 1, 10, 10, 8>}, {pipeline_mode = #tpu.pipeline_mode<synchronous>, transform_indices = @transform_1, window_bounds = array<i64: 3, 3, 8, 8>}, {transform_indices = @transform_2, window_bounds = array<i64: 1, 64, 8>}, {transform_indices = @transform_3, window_bounds = array<i64: 1, 1, 8>}, {transform_indices = @transform_4, window_bounds = array<i64: 1, 1, 8>}]} {
    %cst = arith.constant 0.000000e+00 : f32
    %0 = vector.broadcast %cst : f32 to vector<64x8xf32>
    %c0 = arith.constant 0 : index
    %c0_0 = arith.constant 0 : index
    %c0_1 = arith.constant 0 : index
    %c0_2 = arith.constant 0 : index
    %c0_3 = arith.constant 0 : index
    %1 = vector.load %arg1[%c0, %c0_0, %c0_1, %c0_2, %c0_3] : memref<1x1x10x10x8xf32, #tpu.memory_space<vmem>>, vector<1x1x8x8x8xf32>
    %2 = vector.shape_cast %1 : vector<1x1x8x8x8xf32> to vector<8x8x8xf32>
    %3 = vector.shape_cast %2 : vector<8x8x8xf32> to vector<64x8xf32>
    %c0_4 = arith.constant 0 : index
    %c0_5 = arith.constant 0 : index
    %c0_6 = arith.constant 0 : index
    %c0_7 = arith.constant 0 : index
    %4 = vector.load %arg2[%c0_4, %c0_5, %c0_6, %c0_7] : memref<3x3x8x8xf32, #tpu.memory_space<vmem>>, vector<1x1x8x8xf32>
    %5 = vector.shape_cast %4 : vector<1x1x8x8xf32> to vector<8x8xf32>
    %cst_8 = arith.constant dense<0.000000e+00> : vector<64x8xf32>
    %6 = tpu.matmul %3, %5, %cst_8 {dimension_numbers = #tpu.dot_dimension_numbers<[1], [0], [0], [1], [0, 0, 1, 1], [], []>} : vector<64x8xf32>, vector<8x8xf32>, vector<64x8xf32> -> vector<64x8xf32>
    %7 = arith.addf %0, %6 : vector<64x8xf32>
    %c0_9 = arith.constant 0 : index
    %c0_10 = arith.constant 0 : index
    %c0_11 = arith.constant 0 : index
    %c1 = arith.constant 1 : index
    %c0_12 = arith.constant 0 : index
    %8 = vector.load %arg1[%c0_9, %c0_10, %c0_11, %c1, %c0_12] : memref<1x1x10x10x8xf32, #tpu.memory_space<vmem>>, vector<1x1x8x8x8xf32>
    %9 = vector.shape_cast %8 : vector<1x1x8x8x8xf32> to vector<8x8x8xf32>
    %10 = vector.shape_cast %9 : vector<8x8x8xf32> to vector<64x8xf32>
    %c0_13 = arith.constant 0 : index
    %c1_14 = arith.constant 1 : index
    %c0_15 = arith.constant 0 : index
    %c0_16 = arith.constant 0 : index
    %11 = vector.load %arg2[%c0_13, %c1_14, %c0_15, %c0_16] : memref<3x3x8x8xf32, #tpu.memory_space<vmem>>, vector<1x1x8x8xf32>
    %12 = vector.shape_cast %11 : vector<1x1x8x8xf32> to vector<8x8xf32>
    %cst_17 = arith.constant dense<0.000000e+00> : vector<64x8xf32>
    %13 = tpu.matmul %10, %12, %cst_17 {dimension_numbers = #tpu.dot_dimension_numbers<[1], [0], [0], [1], [0, 0, 1, 1], [], []>} : vector<64x8xf32>, vector<8x8xf32>, vector<64x8xf32> -> vector<64x8xf32>
    %14 = arith.addf %7, %13 : vector<64x8xf32>
    %c0_18 = arith.constant 0 : index
    %c0_19 = arith.constant 0 : index
    %c0_20 = arith.constant 0 : index
    %c2 = arith.constant 2 : index
    %c0_21 = arith.constant 0 : index
    %15 = vector.load %arg1[%c0_18, %c0_19, %c0_20, %c2, %c0_21] : memref<1x1x10x10x8xf32, #tpu.memory_space<vmem>>, vector<1x1x8x8x8xf32>
    %16 = vector.shape_cast %15 : vector<1x1x8x8x8xf32> to vector<8x8x8xf32>
    %17 = vector.shape_cast %16 : vector<8x8x8xf32> to vector<64x8xf32>
    %c0_22 = arith.constant 0 : index
    %c2_23 = arith.constant 2 : index
    %c0_24 = arith.constant 0 : index
    %c0_25 = arith.constant 0 : index
    %18 = vector.load %arg2[%c0_22, %c2_23, %c0_24, %c0_25] : memref<3x3x8x8xf32, #tpu.memory_space<vmem>>, vector<1x1x8x8xf32>
    %19 = vector.shape_cast %18 : vector<1x1x8x8xf32> to vector<8x8xf32>
    %cst_26 = arith.constant dense<0.000000e+00> : vector<64x8xf32>
    %20 = tpu.matmul %17, %19, %cst_26 {dimension_numbers = #tpu.dot_dimension_numbers<[1], [0], [0], [1], [0, 0, 1, 1], [], []>} : vector<64x8xf32>, vector<8x8xf32>, vector<64x8xf32> -> vector<64x8xf32>
    %21 = arith.addf %14, %20 : vector<64x8xf32>
    %c0_27 = arith.constant 0 : index
    %c0_28 = arith.constant 0 : index
    %c1_29 = arith.constant 1 : index
    %c0_30 = arith.constant 0 : index
    %c0_31 = arith.constant 0 : index
    %22 = vector.load %arg1[%c0_27, %c0_28, %c1_29, %c0_30, %c0_31] : memref<1x1x10x10x8xf32, #tpu.memory_space<vmem>>, vector<1x1x8x8x8xf32>
    %23 = vector.shape_cast %22 : vector<1x1x8x8x8xf32> to vector<8x8x8xf32>
    %24 = vector.shape_cast %23 : vector<8x8x8xf32> to vector<64x8xf32>
    %c1_32 = arith.constant 1 : index
    %c0_33 = arith.constant 0 : index
    %c0_34 = arith.constant 0 : index
    %c0_35 = arith.constant 0 : index
    %25 = vector.load %arg2[%c1_32, %c0_33, %c0_34, %c0_35] : memref<3x3x8x8xf32, #tpu.memory_space<vmem>>, vector<1x1x8x8xf32>
    %26 = vector.shape_cast %25 : vector<1x1x8x8xf32> to vector<8x8xf32>
    %cst_36 = arith.constant dense<0.000000e+00> : vector<64x8xf32>
    %27 = tpu.matmul %24, %26, %cst_36 {dimension_numbers = #tpu.dot_dimension_numbers<[1], [0], [0], [1], [0, 0, 1, 1], [], []>} : vector<64x8xf32>, vector<8x8xf32>, vector<64x8xf32> -> vector<64x8xf32>
    %28 = arith.addf %21, %27 : vector<64x8xf32>
    %c0_37 = arith.constant 0 : index
    %c0_38 = arith.constant 0 : index
    %c1_39 = arith.constant 1 : index
    %c1_40 = arith.constant 1 : index
    %c0_41 = arith.constant 0 : index
    %29 = vector.load %arg1[%c0_37, %c0_38, %c1_39, %c1_40, %c0_41] : memref<1x1x10x10x8xf32, #tpu.memory_space<vmem>>, vector<1x1x8x8x8xf32>
    %30 = vector.shape_cast %29 : vector<1x1x8x8x8xf32> to vector<8x8x8xf32>
    %31 = vector.shape_cast %30 : vector<8x8x8xf32> to vector<64x8xf32>
    %c1_42 = arith.constant 1 : index
    %c1_43 = arith.constant 1 : index
    %c0_44 = arith.constant 0 : index
    %c0_45 = arith.constant 0 : index
    %32 = vector.load %arg2[%c1_42, %c1_43, %c0_44, %c0_45] : memref<3x3x8x8xf32, #tpu.memory_space<vmem>>, vector<1x1x8x8xf32>
    %33 = vector.shape_cast %32 : vector<1x1x8x8xf32> to vector<8x8xf32>
    %cst_46 = arith.constant dense<0.000000e+00> : vector<64x8xf32>
    %34 = tpu.matmul %31, %33, %cst_46 {dimension_numbers = #tpu.dot_dimension_numbers<[1], [0], [0], [1], [0, 0, 1, 1], [], []>} : vector<64x8xf32>, vector<8x8xf32>, vector<64x8xf32> -> vector<64x8xf32>
    %35 = arith.addf %28, %34 : vector<64x8xf32>
    %c0_47 = arith.constant 0 : index
    %c0_48 = arith.constant 0 : index
    %c1_49 = arith.constant 1 : index
    %c2_50 = arith.constant 2 : index
    %c0_51 = arith.constant 0 : index
    %36 = vector.load %arg1[%c0_47, %c0_48, %c1_49, %c2_50, %c0_51] : memref<1x1x10x10x8xf32, #tpu.memory_space<vmem>>, vector<1x1x8x8x8xf32>
    %37 = vector.shape_cast %36 : vector<1x1x8x8x8xf32> to vector<8x8x8xf32>
    %38 = vector.shape_cast %37 : vector<8x8x8xf32> to vector<64x8xf32>
    %c1_52 = arith.constant 1 : index
    %c2_53 = arith.constant 2 : index
    %c0_54 = arith.constant 0 : index
    %c0_55 = arith.constant 0 : index
    %39 = vector.load %arg2[%c1_52, %c2_53, %c0_54, %c0_55] : memref<3x3x8x8xf32, #tpu.memory_space<vmem>>, vector<1x1x8x8xf32>
    %40 = vector.shape_cast %39 : vector<1x1x8x8xf32> to vector<8x8xf32>
    %cst_56 = arith.constant dense<0.000000e+00> : vector<64x8xf32>
    %41 = tpu.matmul %38, %40, %cst_56 {dimension_numbers = #tpu.dot_dimension_numbers<[1], [0], [0], [1], [0, 0, 1, 1], [], []>} : vector<64x8xf32>, vector<8x8xf32>, vector<64x8xf32> -> vector<64x8xf32>
    %42 = arith.addf %35, %41 : vector<64x8xf32>
    %c0_57 = arith.constant 0 : index
    %c0_58 = arith.constant 0 : index
    %c2_59 = arith.constant 2 : index
    %c0_60 = arith.constant 0 : index
    %c0_61 = arith.constant 0 : index
    %43 = vector.load %arg1[%c0_57, %c0_58, %c2_59, %c0_60, %c0_61] : memref<1x1x10x10x8xf32, #tpu.memory_space<vmem>>, vector<1x1x8x8x8xf32>
    %44 = vector.shape_cast %43 : vector<1x1x8x8x8xf32> to vector<8x8x8xf32>
    %45 = vector.shape_cast %44 : vector<8x8x8xf32> to vector<64x8xf32>
    %c2_62 = arith.constant 2 : index
    %c0_63 = arith.constant 0 : index
    %c0_64 = arith.constant 0 : index
    %c0_65 = arith.constant 0 : index
    %46 = vector.load %arg2[%c2_62, %c0_63, %c0_64, %c0_65] : memref<3x3x8x8xf32, #tpu.memory_space<vmem>>, vector<1x1x8x8xf32>
    %47 = vector.shape_cast %46 : vector<1x1x8x8xf32> to vector<8x8xf32>
    %cst_66 = arith.constant dense<0.000000e+00> : vector<64x8xf32>
    %48 = tpu.matmul %45, %47, %cst_66 {dimension_numbers = #tpu.dot_dimension_numbers<[1], [0], [0], [1], [0, 0, 1, 1], [], []>} : vector<64x8xf32>, vector<8x8xf32>, vector<64x8xf32> -> vector<64x8xf32>
    %49 = arith.addf %42, %48 : vector<64x8xf32>
    %c0_67 = arith.constant 0 : index
    %c0_68 = arith.constant 0 : index
    %c2_69 = arith.constant 2 : index
    %c1_70 = arith.constant 1 : index
    %c0_71 = arith.constant 0 : index
    %50 = vector.load %arg1[%c0_67, %c0_68, %c2_69, %c1_70, %c0_71] : memref<1x1x10x10x8xf32, #tpu.memory_space<vmem>>, vector<1x1x8x8x8xf32>
    %51 = vector.shape_cast %50 : vector<1x1x8x8x8xf32> to vector<8x8x8xf32>
    %52 = vector.shape_cast %51 : vector<8x8x8xf32> to vector<64x8xf32>
    %c2_72 = arith.constant 2 : index
    %c1_73 = arith.constant 1 : index
    %c0_74 = arith.constant 0 : index
    %c0_75 = arith.constant 0 : index
    %53 = vector.load %arg2[%c2_72, %c1_73, %c0_74, %c0_75] : memref<3x3x8x8xf32, #tpu.memory_space<vmem>>, vector<1x1x8x8xf32>
    %54 = vector.shape_cast %53 : vector<1x1x8x8xf32> to vector<8x8xf32>
    %cst_76 = arith.constant dense<0.000000e+00> : vector<64x8xf32>
    %55 = tpu.matmul %52, %54, %cst_76 {dimension_numbers = #tpu.dot_dimension_numbers<[1], [0], [0], [1], [0, 0, 1, 1], [], []>} : vector<64x8xf32>, vector<8x8xf32>, vector<64x8xf32> -> vector<64x8xf32>
    %56 = arith.addf %49, %55 : vector<64x8xf32>
    %c0_77 = arith.constant 0 : index
    %c0_78 = arith.constant 0 : index
    %c2_79 = arith.constant 2 : index
    %c2_80 = arith.constant 2 : index
    %c0_81 = arith.constant 0 : index
    %57 = vector.load %arg1[%c0_77, %c0_78, %c2_79, %c2_80, %c0_81] : memref<1x1x10x10x8xf32, #tpu.memory_space<vmem>>, vector<1x1x8x8x8xf32>
    %58 = vector.shape_cast %57 : vector<1x1x8x8x8xf32> to vector<8x8x8xf32>
    %59 = vector.shape_cast %58 : vector<8x8x8xf32> to vector<64x8xf32>
    %c2_82 = arith.constant 2 : index
    %c2_83 = arith.constant 2 : index
    %c0_84 = arith.constant 0 : index
    %c0_85 = arith.constant 0 : index
    %60 = vector.load %arg2[%c2_82, %c2_83, %c0_84, %c0_85] : memref<3x3x8x8xf32, #tpu.memory_space<vmem>>, vector<1x1x8x8xf32>
    %61 = vector.shape_cast %60 : vector<1x1x8x8xf32> to vector<8x8xf32>
    %cst_86 = arith.constant dense<0.000000e+00> : vector<64x8xf32>
    %62 = tpu.matmul %59, %61, %cst_86 {dimension_numbers = #tpu.dot_dimension_numbers<[1], [0], [0], [1], [0, 0, 1, 1], [], []>} : vector<64x8xf32>, vector<8x8xf32>, vector<64x8xf32> -> vector<64x8xf32>
    %63 = arith.addf %56, %62 : vector<64x8xf32>
    %c0_87 = arith.constant 0 : index
    %c0_88 = arith.constant 0 : index
    %c0_89 = arith.constant 0 : index
    %64 = vector.load %arg3[%c0_87, %c0_88, %c0_89] : memref<1x64x8xf32, #tpu.memory_space<vmem>>, vector<1x64x8xf32>
    %65 = vector.shape_cast %64 : vector<1x64x8xf32> to vector<64x8xf32>
    %66 = vector.shape_cast %63 : vector<64x8xf32> to vector<1x64x8xf32>
    tpu.vector_store %arg3[%c0_87, %c0_88, %c0_89], %66 {strides = array<i32>} : memref<1x64x8xf32, #tpu.memory_space<vmem>>, vector<1x64x8xf32>,
    %cst_90 = arith.constant dense<0.000000e+00> : vector<8xf32>
    %67 = vector.multi_reduction <add>, %63, %cst_90 [0] : vector<64x8xf32> to vector<8xf32>
    %68 = vector.shape_cast %67 : vector<8xf32> to vector<1x8xf32>
    %c0_91 = arith.constant 0 : index
    %c0_92 = arith.constant 0 : index
    %c0_93 = arith.constant 0 : index
    %69 = vector.load %arg4[%c0_91, %c0_92, %c0_93] : memref<1x1x8xf32, #tpu.memory_space<vmem>>, vector<1x1x8xf32>
    %70 = vector.shape_cast %69 : vector<1x1x8xf32> to vector<1x8xf32>
    %71 = vector.shape_cast %68 : vector<1x8xf32> to vector<1x1x8xf32>
    tpu.vector_store %arg4[%c0_91, %c0_92, %c0_93], %71 {strides = array<i32>} : memref<1x1x8xf32, #tpu.memory_space<vmem>>, vector<1x1x8xf32>,
    %72 = arith.mulf %63, %63 : vector<64x8xf32>
    %cst_94 = arith.constant dense<0.000000e+00> : vector<8xf32>
    %73 = vector.multi_reduction <add>, %72, %cst_94 [0] : vector<64x8xf32> to vector<8xf32>
    %74 = vector.shape_cast %73 : vector<8xf32> to vector<1x8xf32>
    %c0_95 = arith.constant 0 : index
    %c0_96 = arith.constant 0 : index
    %c0_97 = arith.constant 0 : index
    %75 = vector.load %arg5[%c0_95, %c0_96, %c0_97] : memref<1x1x8xf32, #tpu.memory_space<vmem>>, vector<1x1x8xf32>
    %76 = vector.shape_cast %75 : vector<1x1x8xf32> to vector<1x8xf32>
    %77 = vector.shape_cast %74 : vector<1x8xf32> to vector<1x1x8xf32>
    tpu.vector_store %arg5[%c0_95, %c0_96, %c0_97], %77 {strides = array<i32>} : memref<1x1x8xf32, #tpu.memory_space<vmem>>, vector<1x1x8xf32>,
    return
  }
  func.func @transform_0(%arg0: i32) -> (i32, i32, i32, i32, i32) {
    %c0_i32 = arith.constant 0 : i32
    %c0_i32_0 = arith.constant 0 : i32
    %c0_i32_1 = arith.constant 0 : i32
    %c0_i32_2 = arith.constant 0 : i32
    %c0_i32_3 = arith.constant 0 : i32
    return %arg0, %c0_i32, %c0_i32_0, %c0_i32_1, %c0_i32_2 : i32, i32, i32, i32, i32
  }
  func.func @transform_1(%arg0: i32) -> (i32, i32, i32, i32) {
    %c0_i32 = arith.constant 0 : i32
    %c0_i32_0 = arith.constant 0 : i32
    %c0_i32_1 = arith.constant 0 : i32
    %c0_i32_2 = arith.constant 0 : i32
    %c0_i32_3 = arith.constant 0 : i32
    return %c0_i32, %c0_i32_0, %c0_i32_1, %c0_i32_2 : i32, i32, i32, i32
  }
  func.func @transform_2(%arg0: i32) -> (i32, i32, i32) {
    %c0_i32 = arith.constant 0 : i32
    %c0_i32_0 = arith.constant 0 : i32
    %c0_i32_1 = arith.constant 0 : i32
    return %arg0, %c0_i32, %c0_i32_0 : i32, i32, i32
  }
  func.func @transform_3(%arg0: i32) -> (i32, i32, i32) {
    %c0_i32 = arith.constant 0 : i32
    %c0_i32_0 = arith.constant 0 : i32
    %c0_i32_1 = arith.constant 0 : i32
    return %arg0, %c0_i32, %c0_i32_0 : i32, i32, i32
  }
  func.func @transform_4(%arg0: i32) -> (i32, i32, i32) {
    %c0_i32 = arith.constant 0 : i32
    %c0_i32_0 = arith.constant 0 : i32
    %c0_i32_1 = arith.constant 0 : i32
    return %arg0, %c0_i32, %c0_i32_0 : i32, i32, i32
  }
}

module attributes {stable_mosaic.version = 11 : i64} {
  func.func @_conv_bn_stats_kernel(%arg0: i32, %arg1: memref<1x1x8x8x4xf32, #tpu.memory_space<vmem>>, %arg2: memref<1x1x4x8xf32, #tpu.memory_space<vmem>>, %arg3: memref<1x64x8xf32, #tpu.memory_space<vmem>>, %arg4: memref<1x1x8xf32, #tpu.memory_space<vmem>>, %arg5: memref<1x1x8xf32, #tpu.memory_space<vmem>>) attributes {dimension_semantics = [#tpu.dimension_semantics<parallel>], iteration_bounds = array<i64: 2>, scalar_prefetch = 0 : i64, scratch_operands = 0 : i64, tpu.core_type = #tpu.core_type<tc>, window_params = [{transform_indices = @transform_0, window_bounds = array<i64: 1, 1, 8, 8, 4>}, {pipeline_mode = #tpu.pipeline_mode<synchronous>, transform_indices = @transform_1, window_bounds = array<i64: 1, 1, 4, 8>}, {transform_indices = @transform_2, window_bounds = array<i64: 1, 64, 8>}, {transform_indices = @transform_3, window_bounds = array<i64: 1, 1, 8>}, {transform_indices = @transform_4, window_bounds = array<i64: 1, 1, 8>}]} {
    %cst = arith.constant 0.000000e+00 : f32
    %0 = vector.broadcast %cst : f32 to vector<64x8xf32>
    %c0 = arith.constant 0 : index
    %c0_0 = arith.constant 0 : index
    %c0_1 = arith.constant 0 : index
    %c0_2 = arith.constant 0 : index
    %c0_3 = arith.constant 0 : index
    %1 = vector.load %arg1[%c0, %c0_0, %c0_1, %c0_2, %c0_3] : memref<1x1x8x8x4xf32, #tpu.memory_space<vmem>>, vector<1x1x8x8x4xf32>
    %2 = vector.shape_cast %1 : vector<1x1x8x8x4xf32> to vector<8x8x4xf32>
    %3 = vector.shape_cast %2 : vector<8x8x4xf32> to vector<64x4xf32>
    %c0_4 = arith.constant 0 : index
    %c0_5 = arith.constant 0 : index
    %c0_6 = arith.constant 0 : index
    %c0_7 = arith.constant 0 : index
    %4 = vector.load %arg2[%c0_4, %c0_5, %c0_6, %c0_7] : memref<1x1x4x8xf32, #tpu.memory_space<vmem>>, vector<1x1x4x8xf32>
    %5 = vector.shape_cast %4 : vector<1x1x4x8xf32> to vector<4x8xf32>
    %cst_8 = arith.constant dense<0.000000e+00> : vector<64x8xf32>
    %6 = tpu.matmul %3, %5, %cst_8 {dimension_numbers = #tpu.dot_dimension_numbers<[1], [0], [0], [1], [0, 0, 1, 1], [], []>} : vector<64x4xf32>, vector<4x8xf32>, vector<64x8xf32> -> vector<64x8xf32>
    %7 = arith.addf %0, %6 : vector<64x8xf32>
    %c0_9 = arith.constant 0 : index
    %c0_10 = arith.constant 0 : index
    %c0_11 = arith.constant 0 : index
    %8 = vector.load %arg3[%c0_9, %c0_10, %c0_11] : memref<1x64x8xf32, #tpu.memory_space<vmem>>, vector<1x64x8xf32>
    %9 = vector.shape_cast %8 : vector<1x64x8xf32> to vector<64x8xf32>
    %10 = vector.shape_cast %7 : vector<64x8xf32> to vector<1x64x8xf32>
    tpu.vector_store %arg3[%c0_9, %c0_10, %c0_11], %10 {strides = array<i32>} : memref<1x64x8xf32, #tpu.memory_space<vmem>>, vector<1x64x8xf32>,
    %cst_12 = arith.constant dense<0.000000e+00> : vector<8xf32>
    %11 = vector.multi_reduction <add>, %7, %cst_12 [0] : vector<64x8xf32> to vector<8xf32>
    %12 = vector.shape_cast %11 : vector<8xf32> to vector<1x8xf32>
    %c0_13 = arith.constant 0 : index
    %c0_14 = arith.constant 0 : index
    %c0_15 = arith.constant 0 : index
    %13 = vector.load %arg4[%c0_13, %c0_14, %c0_15] : memref<1x1x8xf32, #tpu.memory_space<vmem>>, vector<1x1x8xf32>
    %14 = vector.shape_cast %13 : vector<1x1x8xf32> to vector<1x8xf32>
    %15 = vector.shape_cast %12 : vector<1x8xf32> to vector<1x1x8xf32>
    tpu.vector_store %arg4[%c0_13, %c0_14, %c0_15], %15 {strides = array<i32>} : memref<1x1x8xf32, #tpu.memory_space<vmem>>, vector<1x1x8xf32>,
    %16 = arith.mulf %7, %7 : vector<64x8xf32>
    %cst_16 = arith.constant dense<0.000000e+00> : vector<8xf32>
    %17 = vector.multi_reduction <add>, %16, %cst_16 [0] : vector<64x8xf32> to vector<8xf32>
    %18 = vector.shape_cast %17 : vector<8xf32> to vector<1x8xf32>
    %c0_17 = arith.constant 0 : index
    %c0_18 = arith.constant 0 : index
    %c0_19 = arith.constant 0 : index
    %19 = vector.load %arg5[%c0_17, %c0_18, %c0_19] : memref<1x1x8xf32, #tpu.memory_space<vmem>>, vector<1x1x8xf32>
    %20 = vector.shape_cast %19 : vector<1x1x8xf32> to vector<1x8xf32>
    %21 = vector.shape_cast %18 : vector<1x8xf32> to vector<1x1x8xf32>
    tpu.vector_store %arg5[%c0_17, %c0_18, %c0_19], %21 {strides = array<i32>} : memref<1x1x8xf32, #tpu.memory_space<vmem>>, vector<1x1x8xf32>,
    return
  }
  func.func @transform_0(%arg0: i32) -> (i32, i32, i32, i32, i32) {
    %c0_i32 = arith.constant 0 : i32
    %c0_i32_0 = arith.constant 0 : i32
    %c0_i32_1 = arith.constant 0 : i32
    %c0_i32_2 = arith.constant 0 : i32
    %c0_i32_3 = arith.constant 0 : i32
    return %arg0, %c0_i32, %c0_i32_0, %c0_i32_1, %c0_i32_2 : i32, i32, i32, i32, i32
  }
  func.func @transform_1(%arg0: i32) -> (i32, i32, i32, i32) {
    %c0_i32 = arith.constant 0 : i32
    %c0_i32_0 = arith.constant 0 : i32
    %c0_i32_1 = arith.constant 0 : i32
    %c0_i32_2 = arith.constant 0 : i32
    %c0_i32_3 = arith.constant 0 : i32
    return %c0_i32, %c0_i32_0, %c0_i32_1, %c0_i32_2 : i32, i32, i32, i32
  }
  func.func @transform_2(%arg0: i32) -> (i32, i32, i32) {
    %c0_i32 = arith.constant 0 : i32
    %c0_i32_0 = arith.constant 0 : i32
    %c0_i32_1 = arith.constant 0 : i32
    return %arg0, %c0_i32, %c0_i32_0 : i32, i32, i32
  }
  func.func @transform_3(%arg0: i32) -> (i32, i32, i32) {
    %c0_i32 = arith.constant 0 : i32
    %c0_i32_0 = arith.constant 0 : i32
    %c0_i32_1 = arith.constant 0 : i32
    return %arg0, %c0_i32, %c0_i32_0 : i32, i32, i32
  }
  func.func @transform_4(%arg0: i32) -> (i32, i32, i32) {
    %c0_i32 = arith.constant 0 : i32
    %c0_i32_0 = arith.constant 0 : i32
    %c0_i32_1 = arith.constant 0 : i32
    return %arg0, %c0_i32, %c0_i32_0 : i32, i32, i32
  }
}

module attributes {stable_mosaic.version = 11 : i64} {
  func.func @_bn_add_bn_relu_kernel(%arg0: i32, %arg1: memref<8x128xf32, #tpu.memory_space<vmem>>, %arg2: memref<8x128xf32, #tpu.memory_space<vmem>>, %arg3: memref<1x128xf32, #tpu.memory_space<vmem>>, %arg4: memref<1x128xf32, #tpu.memory_space<vmem>>, %arg5: memref<1x128xf32, #tpu.memory_space<vmem>>, %arg6: memref<1x128xf32, #tpu.memory_space<vmem>>, %arg7: memref<8x128xf32, #tpu.memory_space<vmem>>) attributes {dimension_semantics = [#tpu.dimension_semantics<parallel>], iteration_bounds = array<i64: 1>, scalar_prefetch = 0 : i64, scratch_operands = 0 : i64, tpu.core_type = #tpu.core_type<tc>, window_params = [{transform_indices = @transform_0, window_bounds = array<i64: 8, 128>}, {transform_indices = @transform_1, window_bounds = array<i64: 8, 128>}, {pipeline_mode = #tpu.pipeline_mode<synchronous>, transform_indices = @transform_2, window_bounds = array<i64: 1, 128>}, {pipeline_mode = #tpu.pipeline_mode<synchronous>, transform_indices = @transform_3, window_bounds = array<i64: 1, 128>}, {pipeline_mode = #tpu.pipeline_mode<synchronous>, transform_indices = @transform_4, window_bounds = array<i64: 1, 128>}, {pipeline_mode = #tpu.pipeline_mode<synchronous>, transform_indices = @transform_5, window_bounds = array<i64: 1, 128>}, {transform_indices = @transform_6, window_bounds = array<i64: 8, 128>}]} {
    %c0 = arith.constant 0 : index
    %c0_0 = arith.constant 0 : index
    %0 = vector.load %arg1[%c0, %c0_0] : memref<8x128xf32, #tpu.memory_space<vmem>>, vector<8x128xf32>
    %c0_1 = arith.constant 0 : index
    %c0_2 = arith.constant 0 : index
    %1 = vector.load %arg3[%c0_1, %c0_2] : memref<1x128xf32, #tpu.memory_space<vmem>>, vector<1x128xf32>
    %2 = vector.broadcast %1 : vector<1x128xf32> to vector<8x128xf32>
    %3 = arith.mulf %0, %2 : vector<8x128xf32>
    %c0_3 = arith.constant 0 : index
    %c0_4 = arith.constant 0 : index
    %4 = vector.load %arg4[%c0_3, %c0_4] : memref<1x128xf32, #tpu.memory_space<vmem>>, vector<1x128xf32>
    %5 = vector.broadcast %4 : vector<1x128xf32> to vector<8x128xf32>
    %6 = arith.addf %3, %5 : vector<8x128xf32>
    %c0_5 = arith.constant 0 : index
    %c0_6 = arith.constant 0 : index
    %7 = vector.load %arg2[%c0_5, %c0_6] : memref<8x128xf32, #tpu.memory_space<vmem>>, vector<8x128xf32>
    %c0_7 = arith.constant 0 : index
    %c0_8 = arith.constant 0 : index
    %8 = vector.load %arg5[%c0_7, %c0_8] : memref<1x128xf32, #tpu.memory_space<vmem>>, vector<1x128xf32>
    %9 = vector.broadcast %8 : vector<1x128xf32> to vector<8x128xf32>
    %10 = arith.mulf %7, %9 : vector<8x128xf32>
    %c0_9 = arith.constant 0 : index
    %c0_10 = arith.constant 0 : index
    %11 = vector.load %arg6[%c0_9, %c0_10] : memref<1x128xf32, #tpu.memory_space<vmem>>, vector<1x128xf32>
    %12 = vector.broadcast %11 : vector<1x128xf32> to vector<8x128xf32>
    %13 = arith.addf %10, %12 : vector<8x128xf32>
    %14 = arith.addf %6, %13 : vector<8x128xf32>
    %cst = arith.constant 0.000000e+00 : f32
    %15 = vector.broadcast %cst : f32 to vector<8x128xf32>
    %16 = arith.maximumf %14, %15 : vector<8x128xf32>
    %c0_11 = arith.constant 0 : index
    %c0_12 = arith.constant 0 : index
    %17 = vector.load %arg7[%c0_11, %c0_12] : memref<8x128xf32, #tpu.memory_space<vmem>>, vector<8x128xf32>
    tpu.vector_store %arg7[%c0_11, %c0_12], %16 {strides = array<i32>} : memref<8x128xf32, #tpu.memory_space<vmem>>, vector<8x128xf32>,
    return
  }
  func.func @transform_0(%arg0: i32) -> (i32, i32) {
    %c0_i32 = arith.constant 0 : i32
    %c0_i32_0 = arith.constant 0 : i32
    return %arg0, %c0_i32 : i32, i32
  }
  func.func @transform_1(%arg0: i32) -> (i32, i32) {
    %c0_i32 = arith.constant 0 : i32
    %c0_i32_0 = arith.constant 0 : i32
    return %arg0, %c0_i32 : i32, i32
  }
  func.func @transform_2(%arg0: i32) -> (i32, i32) {
    %c0_i32 = arith.constant 0 : i32
    %c0_i32_0 = arith.constant 0 : i32
    %c0_i32_1 = arith.constant 0 : i32
    return %c0_i32, %c0_i32_0 : i32, i32
  }
  func.func @transform_3(%arg0: i32) -> (i32, i32) {
    %c0_i32 = arith.constant 0 : i32
    %c0_i32_0 = arith.constant 0 : i32
    %c0_i32_1 = arith.constant 0 : i32
    return %c0_i32, %c0_i32_0 : i32, i32
  }
  func.func @transform_4(%arg0: i32) -> (i32, i32) {
    %c0_i32 = arith.constant 0 : i32
    %c0_i32_0 = arith.constant 0 : i32
    %c0_i32_1 = arith.constant 0 : i32
    return %c0_i32, %c0_i32_0 : i32, i32
  }
  func.func @transform_5(%arg0: i32) -> (i32, i32) {
    %c0_i32 = arith.constant 0 : i32
    %c0_i32_0 = arith.constant 0 : i32
    %c0_i32_1 = arith.constant 0 : i32
    return %c0_i32, %c0_i32_0 : i32, i32
  }
  func.func @transform_6(%arg0: i32) -> (i32, i32) {
    %c0_i32 = arith.constant 0 : i32
    %c0_i32_0 = arith.constant 0 : i32
    return %arg0, %c0_i32 : i32, i32
  }
}

</mosaic_0001>

<bundles_post_ra>
// kernel: tile.39
= control target key start
LH: loop header
LB: loop body
LE: loop exit
PB: predicated region body
PF: predicated region fallthrough
CT: control target
= control target key end

     0   :  { %s133_s10 = smov 120   ;;  %s134_s11 = smov 104   ;;  %vm3_vm0 = vcmask 64512   ;;  %vm9_vm1 = vcmask 1048512   ;;  %vm15_vm2 = vcmask 982912   ;;  %vm21_vm3 = vcmask 917312   ;;  %s209_s0 = inlined_call_operand.vmem [shape: f32[16,8], index: 0, kind: input, shape index: {}]   ;;  %s210_s1 = inlined_call_operand.vmem [shape: f32[1,128], index: 1, kind: output, shape index: {}]  }
   0x1   :  { %v103_v0 = vld [vmem:[%s209_s0 + $0xf] sm:$0x1]   ;;  %v105_v1 = vld [vmem:[%s209_s0 + $0xd] sm:$0x1]   ;;  %v104_v2 = vld [vmem:[%s209_s0 + $0xe] sm:$0x1]  }
   0x2   :  { %7 = vrot.lane.b32.xlu0 %v103_v0, %s133_s10  ;;  %19 = vrot.lane.b32.xlu1 %v105_v1, %s134_s11  ;;  %v106_v3 = vld [vmem:[%s209_s0 + $0xc] sm:$0x1]   ;;  %s135_s16 = smov 112   ;;  %s136_s17 = smov 96   ;;  %v107_v4 = vld [vmem:[%s209_s0 + $0xb] sm:$0x1]  }
   0x3   :  { %v108_v5 = vld [vmem:[%s209_s0 + $0xa] sm:$0x1]   ;;  %v2_v6 = vld [vmem:[%s209_s0] sm:$0x1]   ;;  %s137_s24 = smov 88   ;;  %s138_s25 = smov 80  }
   0x4   :  { %4 = vst.msk [vmem:[#allocation0] sm:$0x1] %vm3_vm0, %v2_v6   ;;  %v109_v7 = vld [vmem:[%s209_s0 + $0x9] sm:$0x1]   ;;  %v110_v8 = vld [vmem:[%s209_s0 + $0x8] sm:$0x1]  }
   0x5   :  { %s139_s30 = smov 72   ;;  %s140_s2 = smov 64   ;;  %v111_v9 = vld [vmem:[%s209_s0 + $0x7] sm:$0x1]   ;;  %v112_v10 = vld [vmem:[%s209_s0 + $0x6] sm:$0x1]  }
   0x6   :  { %13 = vrot.lane.b32.xlu0 %v104_v2, %s135_s16  ;;  %25 = vrot.lane.b32.xlu1 %v106_v3, %s136_s17  ;;  %s141_s7 = smov 56   ;;  %s142_s8 = smov 48   ;;  %v113_v11 = vld [vmem:[%s209_s0 + $0x5] sm:$0x1]   ;;  %v114_v12 = vld [vmem:[%s209_s0 + $0x4] sm:$0x1]  }
   0x7   :  { %s143_s13 = smov 40   ;;  %s144_s14 = smov 32   ;;  %v115_v13 = vld [vmem:[%s209_s0 + $0x3] sm:$0x1]   ;;  %v116_v14 = vld [vmem:[%s209_s0 + $0x2] sm:$0x1]  }
   0x8   :  { %s145_s19 = smov 24   ;;  %s146_s20 = smov 16   ;;  %v117_v15 = vld [vmem:[%s209_s0 + $0x1] sm:$0x1]   ;;  %vm27_vm4 = vcmask 851712   ;;  %vm33_vm5 = vcmask 786112  }
   0x9   :  { %s147_s0 = smov 8   ;;  %vm39_vm6 = vcmask 720512   ;;  %vm45_vm7 = vcmask 654912   ;;  %vm51_vm8 = vcmask 589312   ;;  %vm57_vm9 = vcmask 523712  }
   0xa   :  { %31 = vrot.lane.b32.xlu0 %v107_v4, %s137_s24  ;;  %37 = vrot.lane.b32.xlu1 %v108_v5, %s138_s25  ;;  %vm63_vm10 = vcmask 458112   ;;  %vm69_vm11 = vcmask 392512   ;;  %vm75_vm12 = vcmask 326912   ;;  %vm81_vm13 = vcmask 261312  }
   0xb   :  { %vm87_vm14 = vcmask 195712   ;;  %vm93_vm15 = vcmask 130112  }
   0xe   :  { %43 = vrot.lane.b32.xlu0 %v109_v7, %s139_s30  ;;  %49 = vrot.lane.b32.xlu1 %v110_v8, %s140_s2 }
  0x12   :  { %55 = vrot.lane.b32.xlu0 %v111_v9, %s141_s7  ;;  %61 = vrot.lane.b32.xlu1 %v112_v10, %s142_s8 }
  0x16   :  { %67 = vrot.lane.b32.xlu0 %v113_v11, %s143_s13  ;;  %73 = vrot.lane.b32.xlu1 %v114_v12, %s144_s14 }
  0x1a   :  { %79 = vrot.lane.b32.xlu0 %v115_v13, %s145_s19  ;;  %85 = vrot.lane.b32.xlu1 %v116_v14, %s146_s20 }
  0x1e   :  { %91 = vrot.lane.b32.xlu0 %v117_v15, %s147_s0 }
  0x74   :  { %v8_v16 = vpop.permute.xlu0 %7   ;;  %v20_v17 = vpop.permute.xlu1 %19  }
  0x75   :  { %10 = vst.msk [vmem:[#allocation0] sm:$0x1] %vm9_vm1, %v8_v16  }
  0x78   :  { %v14_v18 = vpop.permute.xlu0 %13   ;;  %v26_v19 = vpop.permute.xlu1 %25  }
  0x79   :  { %16 = vst.msk [vmem:[#allocation0] sm:$0x1] %vm15_vm2, %v14_v18  }
  0x7a   :  { %22 = vst.msk [vmem:[#allocation0] sm:$0x1] %vm21_vm3, %v20_v17  }
  0x7b   :  { %28 = vst.msk [vmem:[#allocation0] sm:$0x1] %vm27_vm4, %v26_v19  }
  0x7c   :  { %v32_v20 = vpop.permute.xlu0 %31   ;;  %v38_v21 = vpop.permute.xlu1 %37  }
  0x7d   :  { %34 = vst.msk [vmem:[#allocation0] sm:$0x1] %vm33_vm5, %v32_v20  }
  0x7e   :  { %40 = vst.msk [vmem:[#allocation0] sm:$0x1] %vm39_vm6, %v38_v21  }
  0x80   :  { %v44_v22 = vpop.permute.xlu0 %43   ;;  %v50_v23 = vpop.permute.xlu1 %49  }
  0x81   :  { %46 = vst.msk [vmem:[#allocation0] sm:$0x1] %vm45_vm7, %v44_v22  }
  0x82   :  { %52 = vst.msk [vmem:[#allocation0] sm:$0x1] %vm51_vm8, %v50_v23  }
  0x84   :  { %v56_v24 = vpop.permute.xlu0 %55   ;;  %v62_v25 = vpop.permute.xlu1 %61  }
  0x85   :  { %58 = vst.msk [vmem:[#allocation0] sm:$0x1] %vm57_vm9, %v56_v24  }
  0x86   :  { %64 = vst.msk [vmem:[#allocation0] sm:$0x1] %vm63_vm10, %v62_v25  }
  0x88   :  { %v68_v26 = vpop.permute.xlu0 %67   ;;  %v74_v27 = vpop.permute.xlu1 %73  }
  0x89   :  { %70 = vst.msk [vmem:[#allocation0] sm:$0x1] %vm69_vm11, %v68_v26  }
  0x8a   :  { %76 = vst.msk [vmem:[#allocation0] sm:$0x1] %vm75_vm12, %v74_v27  }
  0x8c   :  { %v80_v28 = vpop.permute.xlu0 %79   ;;  %v86_v29 = vpop.permute.xlu1 %85  }
  0x8d   :  { %82 = vst.msk [vmem:[#allocation0] sm:$0x1] %vm81_vm13, %v80_v28  }
  0x8e   :  { %88 = vst.msk [vmem:[#allocation0] sm:$0x1] %vm87_vm14, %v86_v29  }
  0x90   :  { %v92_v30 = vpop.permute.xlu0 %91  }
  0x91   :  { %94 = vst.msk [vmem:[#allocation0] sm:$0x1] %vm93_vm15, %v92_v30  }
  0x98   :  { %v99_v31 = vld [vmem:[#allocation0] sm:$0x1] }
  0x99   :  { %102 = vst [vmem:[%s210_s1] sm:$0x1] %v99_v31 }

// kernel: tile.38
= control target key start
LH: loop header
LB: loop body
LE: loop exit
PB: predicated region body
PF: predicated region fallthrough
CT: control target
= control target key end

     0   :  { %s28_s0 = inlined_call_operand.vmem [shape: f32[8], index: 0, kind: input, shape index: {}]   ;;  %s29_s1 = inlined_call_operand.vmem [shape: f32[16,8], index: 1, kind: output, shape index: {}]  }
   0x1   :  { %v4_v0 = vld [vmem:[%s28_s0] ss:$0 sm:$0xff] }
   0x2   :  { %5 = vst [vmem:[%s29_s1] sm:$0xff] %v4_v0  ;;  %8 = vst [vmem:[%s29_s1 + $0x8] sm:$0xff] %v4_v0 }

// kernel: a_call__.6
= control target key start
LH: loop header
LB: loop body
LE: loop exit
PB: predicated region body
PF: predicated region fallthrough
CT: control target
= control target key end

     0   :  { %s71_s0 = inlined_call_operand.vmem [shape: f32[8,128], index: 0, kind: input, shape index: {}, may-alias: {0,3}]   ;;  %s72_s1 = inlined_call_operand.vmem [shape: f32[1,128], index: 1, kind: input, shape index: {}]   ;;  %s73_s2 = inlined_call_operand.vmem [shape: f32[1,128], index: 2, kind: input, shape index: {}]   ;;  %s74_s3 = inlined_call_operand.vmem [shape: f32[8,128], index: 3, kind: output, shape index: {}, may-alias: {0,3}]  }
   0x1   :  { %v14_v0 = vld [vmem:[%s71_s0] sm:$0xff] }
   0x2   :  { %v37_v1 = vld [vmem:[%s72_s1] ss:$0 sm:$0xff] }
   0x3   :  { %v38_v2 = vld [vmem:[%s73_s2] ss:$0 sm:$0xff]  ;;  %v22_v3 = vmul.f32 %v37_v1, %v14_v0 }
   0x5   :  { %v30_v4 = vadd.f32 %v38_v2, %v22_v3 }
   0x7   :  { %v31_v5 = vmax.f32 %v30_v4, 0.0 }
   0x9   :  { %32 = vst [vmem:[%s74_s3] sm:$0xff] %v31_v5 }

// kernel: a_call__.5
= control target key start
LH: loop header
LB: loop body
LE: loop exit
PB: predicated region body
PF: predicated region fallthrough
CT: control target
= control target key end

     0   :  { %s2129_s15 = smov 0   ;;  %s2469_s0 = inlined_call_operand.vmem [shape: f32[2,4,9,9,4], index: 0, kind: input, shape index: {}]   ;;  %s2470_s1 = inlined_call_operand.vmem [shape: f32[3,3,4,8], index: 1, kind: input, shape index: {}]   ;;  %s2471_s2 = inlined_call_operand.vmem [shape: f32[2,64,8], index: 2, kind: output, shape index: {0}]   ;;  %s2472_s3 = inlined_call_operand.vmem [shape: f32[2,1,8], index: 3, kind: output, shape index: {1}]   ;;  %s2473_s4 = inlined_call_operand.vmem [shape: f32[2,1,8], index: 4, kind: output, shape index: {2}]  }
   0x1 LB: > { %s1722_s16 = sadd.s32 4294967295, %s2102_s15   ;;  %p1726_p0 = scmp.ge.s32.totalorder %s2102_s15, 1  ;;  %s2102_s15 = sphi %s2129_s15, %s15_s15  }
   0x2   : > { %p167_p1 = scmp.lt.s32.totalorder %s2102_s15, 3 }
   0x4   : > { %p168_p2 = pnand %p1726_p0, %p167_p1 }
   0x5   : > { %p199_p3 = scmp.lt.s32.totalorder (!%p168_p2), %s1722_s16, 1 }
   0x6   : > { %171 = sbr.rel (%p168_p2) target bundleno = 305 (0x131), region = 28 }
   0xb   : > { %v1738_v0 = vld [vmem:[%s2470_s1 + $0x4] sm:$0xf]  ;;  %vm260_vm0 = vcmask 1043456   ;;  %v223_v1 = vld [vmem:[%s2470_s1] sm:$0xf]  ;;  %s2475_s16 = smov (!%p199_p3, %s1722_s16), 1 }
   0xc   : > { %2085 = vmatprep.subr.msk.mxu1 %vm260_vm0, %v1738_v0  ;;  %1959 = vmatprep.subr.msk.mxu0 %vm260_vm0, %v1738_v0  ;;  %v1757_v2 = vld [vmem:[%s2470_s1 + $0x8] sm:$0xf]  ;;  %s2087_s23 = smul.u32 576, %s2475_s16  ;;  %vm235_vm1 = vcmask 31744   ;;  %v1775_v9 = vld [vmem:[%s2470_s1 + $0xc] sm:$0xf]  ;;  %s211_s21 = scalar_lea.vmem %s2472_s3, %s2475_s16 }
   0xd   : > { %2086 = vmatpush3.msk.msra.mxu1 %vm260_vm0, %v1738_v0  ;;  %1960 = vmatpush3.msk.msra.mxu0 %vm260_vm0, %v1738_v0  ;;  %v1793_v10 = vld [vmem:[%s2470_s1 + $0x10] sm:$0xf]  ;;  %v1811_v19 = vld [vmem:[%s2470_s1 + $0x14] sm:$0xf]  ;;  %v1829_v20 = vld [vmem:[%s2470_s1 + $0x18] sm:$0xf]  ;;  %s214_s24 = scalar_lea.vmem %s2473_s4, %s2475_s16 }
   0xe   : > { %1973 = vmatprep.subr.msk.mxu1 %vm260_vm0, %v223_v1  ;;  %1987 = vmatprep.subr.msk.mxu0 %vm260_vm0, %v1757_v2  ;;  %s2158_s26 = scalar_lea.vmem %s2469_s0, %s2087_s23  ;;  %v1847_v37 = vld [vmem:[%s2470_s1 + $0x1c] sm:$0xf]  ;;  %v1865_v38 = vld [vmem:[%s2470_s1 + $0x20] sm:$0xf]  ;;  %s1877_s13 = sshll.u32 %s2475_s16, 6  ;;  %vm1555_vm2 = vcmask 64512  }
   0xf   : > { %v1730_v3 = vld [vmem:[%s2158_s26 + $0x90] sm:$0xff]  ;;  %v2165_v5 = vld [vmem:[%s2158_s26 + $0xa0] sm:$0xff]  ;;  %s2420_s18 = scalar_lea.vmem %s2471_s2, %s1877_s13  ;;  %vm1585_vm3 = vcmask 57344  }
  0x10   : > { %v2162_v4 = vld [vmem:[%s2158_s26 + $0xd0] sm:$0xff]  ;;  %1961 = vmatprep.mubr.msk.f32.mxu0 %vm235_vm1, %v1730_v3  ;;  %v2171_v6 = vld [vmem:[%s2158_s26 + $0xe0] sm:$0xff] }
  0x11   : > { %1967 = vmatprep.mubr.msk.f32.mxu1 %vm235_vm1, %v2162_v4  ;;  %v2174_v7 = vld [vmem:[%s2158_s26 + $0xb0] sm:$0xff]  ;;  %1962 = vmatmul.mubr.msk.f32.vlgmr.msra.gmra.mxu0 %vm235_vm1, %v2165_v5  ;;  %v2192_v11 = vld [vmem:[%s2158_s26 + $0xc0] sm:$0xff] }
  0x12   : > { %v2177_v8 = vld [vmem:[%s2158_s26 + $0xf0] sm:$0xff]  ;;  %1968 = vmatmul.mubr.msk.f32.vlgmr.msra.gmra.mxu1 %vm235_vm1, %v2171_v6  ;;  %1988 = vmatpush3.msk.msra.mxu0 %vm260_vm0, %v1757_v2  ;;  %v2195_v12 = vld [vmem:[%s2158_s26 + $0x100] sm:$0xff] }
  0x13   : > { %1974 = vmatpush3.msk.msra.mxu1 %vm260_vm0, %v223_v1  ;;  %1964 = vmatprep.mubr.msk.f32.mxu0 %vm235_vm1, %v2174_v7  ;;  %v215_v13 = vld [vmem:[%s2158_s26] sm:$0xff]  ;;  %v2212_v15 = vld [vmem:[%s2158_s26 + $0x10] sm:$0xff] }
  0x14   : > { %1970 = vmatprep.mubr.msk.f32.mxu1 %vm235_vm1, %v2177_v8  ;;  %v501_v14 = vld [vmem:[%s2158_s26 + $0x1] sm:$0xff]  ;;  %2001 = vmatprep.subr.msk.mxu1 %vm260_vm0, %v1775_v9  ;;  %v2215_v16 = vld [vmem:[%s2158_s26 + $0x11] sm:$0xff] }
  0x15   : > { %2015 = vmatprep.subr.msk.mxu0 %vm260_vm0, %v1793_v10  ;;  %1965 = vmatmul.mubr.msk.f32.gmra.mxu0 %vm235_vm1, %v2192_v11  ;;  %v2218_v17 = vld [vmem:[%s2158_s26 + $0x20] sm:$0xff]  ;;  %v2236_v21 = vld [vmem:[%s2158_s26 + $0x30] sm:$0xff] }
  0x16   : > { %1971 = vmatmul.mubr.msk.f32.gmra.mxu1 %vm235_vm1, %v2195_v12  ;;  %1989 = vmatprep.mubr.msk.f32.mxu0 %vm235_vm1, %v501_v14  ;;  %v2221_v18 = vld [vmem:[%s2158_s26 + $0x21] sm:$0xff]  ;;  %v2239_v22 = vld [vmem:[%s2158_s26 + $0x31] sm:$0xff] }
  0x17   : > { %1975 = vmatprep.mubr.msk.f32.mxu1 %vm235_vm1, %v215_v13  ;;  %v2246_v23 = vld [vmem:[%s2158_s26 + $0x40] sm:$0xff]  ;;  %v2262_v25 = vld [vmem:[%s2158_s26 + $0x50] sm:$0xff] }
  0x18   : > { %v2249_v24 = vld [vmem:[%s2158_s26 + $0x41] sm:$0xff]  ;;  %v2265_v26 = vld [vmem:[%s2158_s26 + $0x51] sm:$0xff] }
  0x19   : > { %1990 = vmatmul.mubr.msk.f32.vlgmr.msra.gmra.mxu0 %vm235_vm1, %v2215_v16  ;;  %v2268_v27 = vld [vmem:[%s2158_s26 + $0x60] sm:$0xff]  ;;  %v2282_v29 = vld [vmem:[%s2158_s26 + $0x70] sm:$0xff] }
  0x1a   : > { %1976 = vmatmul.mubr.msk.f32.vlgmr.msra.gmra.mxu1 %vm235_vm1, %v2212_v15  ;;  %2016 = vmatpush3.msk.msra.mxu0 %vm260_vm0, %v1793_v10  ;;  %v2271_v28 = vld [vmem:[%s2158_s26 + $0x61] sm:$0xff]  ;;  %v2285_v30 = vld [vmem:[%s2158_s26 + $0x71] sm:$0xff] }
  0x1b   : > { %2002 = vmatpush3.msk.msra.mxu1 %vm260_vm0, %v1775_v9  ;;  %1978 = vmatprep.mubr.msk.f32.mxu1 %vm235_vm1, %v2218_v17  ;;  %v1767_v31 = vld [vmem:[%s2158_s26 + $0x120] sm:$0xff]  ;;  %v1785_v32 = vld [vmem:[%s2158_s26 + $0x1b0] sm:$0xff] }
  0x1c   : > { %1992 = vmatprep.mubr.msk.f32.mxu0 %vm235_vm1, %v2221_v18  ;;  %2029 = vmatprep.subr.msk.mxu1 %vm260_vm0, %v1811_v19  ;;  %v1768_v33 = vld [vmem:[%s2158_s26 + $0x130] sm:$0xff]  ;;  %v1786_v34 = vld [vmem:[%s2158_s26 + $0x1c0] sm:$0xff] }
  0x1d   : > { %2043 = vmatprep.subr.msk.mxu0 %vm260_vm0, %v1829_v20  ;;  %1993 = vmatmul.mubr.msk.f32.gmra.mxu0 %vm235_vm1, %v2239_v22  ;;  %v1769_v35 = vld [vmem:[%s2158_s26 + $0x140] sm:$0xff]  ;;  %v1787_v36 = vld [vmem:[%s2158_s26 + $0x1d0] sm:$0xff] }
  0x1e   : > { %1979 = vmatmul.mubr.msk.f32.gmra.mxu1 %vm235_vm1, %v2236_v21  ;;  %1995 = vmatprep.mubr.msk.f32.mxu0 %vm235_vm1, %v2249_v24  ;;  %v1770_v39 = vld [vmem:[%s2158_s26 + $0x150] sm:$0xff]  ;;  %v1788_v40 = vld [vmem:[%s2158_s26 + $0x1e0] sm:$0xff] }
  0x1f   : > { %1981 = vmatprep.mubr.msk.f32.mxu1 %vm235_vm1, %v2246_v23  ;;  %v1771_v41 = vld [vmem:[%s2158_s26 + $0x160] sm:$0xff]  ;;  %v1789_v42 = vld [vmem:[%s2158_s26 + $0x1f0] sm:$0xff] }
  0x20   : > { %v1772_v43 = vld [vmem:[%s2158_s26 + $0x170] sm:$0xff]  ;;  %v1790_v44 = vld [vmem:[%s2158_s26 + $0x200] sm:$0xff] }
  0x21   : > { %1996 = vmatmul.mubr.msk.f32.gmra.mxu0 %vm235_vm1, %v2265_v26  ;;  %v1773_v45 = vld [vmem:[%s2158_s26 + $0x180] sm:$0xff]  ;;  %v1791_v46 = vld [vmem:[%s2158_s26 + $0x210] sm:$0xff] }
  0x22   : > { %1982 = vmatmul.mubr.msk.f32.gmra.mxu1 %vm235_vm1, %v2262_v25  ;;  %1998 = vmatprep.mubr.msk.f32.mxu0 %vm235_vm1, %v2271_v28  ;;  %v1774_v47 = vld [vmem:[%s2158_s26 + $0x190] sm:$0xff]  ;;  %v1792_v48 = vld [vmem:[%s2158_s26 + $0x220] sm:$0xff] }
  0x23   : > { %1984 = vmatprep.mubr.msk.f32.mxu1 %vm235_vm1, %v2268_v27  ;;  %v1803_v49 = vld [vmem:[%s2158_s26 + $0x121] sm:$0xff]  ;;  %v1804_v50 = vld [vmem:[%s2158_s26 + $0x131] sm:$0xff] }
  0x24   : > { %v1805_v51 = vld [vmem:[%s2158_s26 + $0x141] sm:$0xff]  ;;  %v1806_v52 = vld [vmem:[%s2158_s26 + $0x151] sm:$0xff] }
  0x25   : > { %1999 = vmatmul.mubr.msk.f32.gmra.mxu0 %vm235_vm1, %v2285_v30  ;;  %v1807_v53 = vld [vmem:[%s2158_s26 + $0x161] sm:$0xff]  ;;  %v1808_v54 = vld [vmem:[%s2158_s26 + $0x171] sm:$0xff] }
  0x26   : > { %1985 = vmatmul.mubr.msk.f32.gmra.mxu1 %vm235_vm1, %v2282_v29  ;;  %2017 = vmatprep.mubr.msk.f32.mxu0 %vm235_vm1, %v1785_v32  ;;  %v1809_v55 = vld [vmem:[%s2158_s26 + $0x181] sm:$0xff]  ;;  %v1810_v56 = vld [vmem:[%s2158_s26 + $0x191] sm:$0xff] }
  0x27   : > { %2003 = vmatprep.mubr.msk.f32.mxu1 %vm235_vm1, %v1767_v31  ;;  %v1828_v57 = vld [vmem:[%s2158_s26 + $0x80] sm:$0xff]  ;;  %v1846_v58 = vld [vmem:[%s2158_s26 + $0x110] sm:$0xff] }
  0x28   : > { %v1864_v59 = vld [vmem:[%s2158_s26 + $0x81] sm:$0xff] }
  0x29   : > { %2018 = vmatmul.mubr.msk.f32.vlgmr.msra.gmra.mxu0 %vm235_vm1, %v1786_v34 }
  0x2a   : > { %2004 = vmatmul.mubr.msk.f32.vlgmr.msra.gmra.mxu1 %vm235_vm1, %v1768_v33  ;;  %2044 = vmatpush3.msk.msra.mxu0 %vm260_vm0, %v1829_v20 }
  0x2b   : > { %2030 = vmatpush3.msk.msra.mxu1 %vm260_vm0, %v1811_v19  ;;  %2006 = vmatprep.mubr.msk.f32.mxu1 %vm235_vm1, %v1769_v35 }
  0x2c   : > { %2020 = vmatprep.mubr.msk.f32.mxu0 %vm235_vm1, %v1787_v36  ;;  %2057 = vmatprep.subr.msk.mxu1 %vm260_vm0, %v1847_v37 }
  0x2d   : > { %2071 = vmatprep.subr.msk.mxu0 %vm260_vm0, %v1865_v38  ;;  %2021 = vmatmul.mubr.msk.f32.gmra.mxu0 %vm235_vm1, %v1788_v40 }
  0x2e   : > { %2007 = vmatmul.mubr.msk.f32.gmra.mxu1 %vm235_vm1, %v1770_v39  ;;  %2023 = vmatprep.mubr.msk.f32.mxu0 %vm235_vm1, %v1789_v42 }
  0x2f   : > { %2009 = vmatprep.mubr.msk.f32.mxu1 %vm235_vm1, %v1771_v41 }
  0x31   : > { %2024 = vmatmul.mubr.msk.f32.gmra.mxu0 %vm235_vm1, %v1790_v44 }
  0x32   : > { %2010 = vmatmul.mubr.msk.f32.gmra.mxu1 %vm235_vm1, %v1772_v43  ;;  %2026 = vmatprep.mubr.msk.f32.mxu0 %vm235_vm1, %v1791_v46 }
  0x33   : > { %2012 = vmatprep.mubr.msk.f32.mxu1 %vm235_vm1, %v1773_v45 }
  0x35   : > { %2027 = vmatmul.mubr.msk.f32.gmra.mxu0 %vm235_vm1, %v1792_v48 }
  0x36   : > { %2013 = vmatmul.mubr.msk.f32.gmra.mxu1 %vm235_vm1, %v1774_v47  ;;  %2045 = vmatprep.mubr.msk.f32.mxu0 %vm235_vm1, %v2212_v15 }
  0x37   : > { %2031 = vmatprep.mubr.msk.f32.mxu1 %vm235_vm1, %v1803_v49 }
  0x39   : > { %2046 = vmatmul.mubr.msk.f32.vlgmr.msra.gmra.mxu0 %vm235_vm1, %v2218_v17 }
  0x3a   : > { %2032 = vmatmul.mubr.msk.f32.vlgmr.msra.gmra.mxu1 %vm235_vm1, %v1804_v50  ;;  %2072 = vmatpush3.msk.msra.mxu0 %vm260_vm0, %v1865_v38 }
  0x3b   : > { %2058 = vmatpush3.msk.msra.mxu1 %vm260_vm0, %v1847_v37  ;;  %2034 = vmatprep.mubr.msk.f32.mxu1 %vm235_vm1, %v1805_v51 }
  0x3c   : > { %2048 = vmatprep.mubr.msk.f32.mxu0 %vm235_vm1, %v2236_v21 }
  0x3d   : > { %2049 = vmatmul.mubr.msk.f32.gmra.mxu0 %vm235_vm1, %v2246_v23 }
  0x3e   : > { %2035 = vmatmul.mubr.msk.f32.gmra.mxu1 %vm235_vm1, %v1806_v52  ;;  %2051 = vmatprep.mubr.msk.f32.mxu0 %vm235_vm1, %v2262_v25 }
  0x3f   : > { %2037 = vmatprep.mubr.msk.f32.mxu1 %vm235_vm1, %v1807_v53 }
  0x41   : > { %2052 = vmatmul.mubr.msk.f32.gmra.mxu0 %vm235_vm1, %v2268_v27 }
  0x42   : > { %2038 = vmatmul.mubr.msk.f32.gmra.mxu1 %vm235_vm1, %v1808_v54  ;;  %2054 = vmatprep.mubr.msk.f32.mxu0 %vm235_vm1, %v2282_v29 }
  0x43   : > { %2040 = vmatprep.mubr.msk.f32.mxu1 %vm235_vm1, %v1809_v55 }
  0x45   : > { %2055 = vmatmul.mubr.msk.f32.gmra.mxu0 %vm235_vm1, %v1828_v57 }
  0x46   : > { %2041 = vmatmul.mubr.msk.f32.gmra.mxu1 %vm235_vm1, %v1810_v56  ;;  %2073 = vmatprep.mubr.msk.f32.mxu0 %vm235_vm1, %v2215_v16 }
  0x47   : > { %2059 = vmatprep.mubr.msk.f32.mxu1 %vm235_vm1, %v2165_v5 }
  0x49   : > { %2074 = vmatmul.mubr.msk.f32.vlgmr.msra.gmra.mxu0 %vm235_vm1, %v2221_v18 }
  0x4a   : > { %2060 = vmatmul.mubr.msk.f32.vlgmr.msra.gmra.mxu1 %vm235_vm1, %v2174_v7  ;;  %2076 = vmatprep.mubr.msk.f32.mxu0 %vm235_vm1, %v2239_v22 }
  0x4b   : > { %2062 = vmatprep.mubr.msk.f32.mxu1 %vm235_vm1, %v2192_v11 }
  0x4d   : > { %2077 = vmatmul.mubr.msk.f32.gmra.mxu0 %vm235_vm1, %v2249_v24 }
  0x4e   : > { %2063 = vmatmul.mubr.msk.f32.gmra.mxu1 %vm235_vm1, %v2162_v4  ;;  %2079 = vmatprep.mubr.msk.f32.mxu0 %vm235_vm1, %v2265_v26 }
  0x4f   : > { %2065 = vmatprep.mubr.msk.f32.mxu1 %vm235_vm1, %v2171_v6 }
  0x51   : > { %2080 = vmatmul.mubr.msk.f32.gmra.mxu0 %vm235_vm1, %v2271_v28 }
  0x52   : > { %2066 = vmatmul.mubr.msk.f32.gmra.mxu1 %vm235_vm1, %v2177_v8  ;;  %2082 = vmatprep.mubr.msk.f32.mxu0 %vm235_vm1, %v2285_v30 }
  0x53   : > { %2068 = vmatprep.mubr.msk.f32.mxu1 %vm235_vm1, %v2195_v12 }
  0x55   : > { %2083 = vmatmul.mubr.msk.f32.gmra.mxu0 %vm235_vm1, %v1864_v59 }
  0x56   : > { %2069 = vmatmul.mubr.msk.f32.gmra.mxu1 %vm235_vm1, %v1846_v58 }
  0xd1   : > { %v1963_v60 = vpop.f32.mrf.mxu0 }
  0xd2   : > { %v1969_v61 = vpop.f32.mrf.mxu1 }
  0xd3   : > { %v330_v62 = vpop.f32.mrf.mxu0 }
  0xd4   : > { %v350_v63 = vpop.f32.mrf.mxu1 }
  0xd5   : > { %v1966_v0 = vpop.f32.mrf.mxu0 }
  0xd6   : > { %v2399_v1 = vpop.f32.mrf.mxu1 }
  0xd7   : > { %v340_v2 = vpop.f32.mrf.mxu0 }
  0xd8   : > { %v2401_v3 = vpop.f32.mrf.mxu1 }
  0xd9   : > { %v1991_v5 = vpop.f32.mrf.mxu0 }
  0xda   : > { %v1977_v4 = vpop.f32.mrf.mxu1 }
  0xdb   : > { %v604_v7 = vpop.f32.mrf.mxu0  ;;  %v468_v36 = vadd.f32 %v1977_v4, %v1963_v60 }
  0xdc   : > { %v462_v6 = vpop.f32.mrf.mxu1 }
  0xdd   : > { %v1994_v9 = vpop.f32.mrf.mxu0  ;;  %v463_v39 = vadd.f32 %v462_v6, %v330_v62  ;;  %v644_v42 = vadd.f32 %v1991_v5, %v468_v36 }
  0xde   : > { %v1980_v8 = vpop.f32.mrf.mxu1 }
  0xdf   : > { %v614_v11 = vpop.f32.mrf.mxu0  ;;  %v478_v43 = vadd.f32 %v1980_v8, %v1966_v0  ;;  %v643_v46 = vadd.f32 %v604_v7, %v463_v39 }
  0xe0   : > { %v472_v10 = vpop.f32.mrf.mxu1 }
  0xe1   : > { %v1997_v13 = vpop.f32.mrf.mxu0  ;;  %v473_v48 = vadd.f32 %v472_v10, %v340_v2  ;;  %v646_v51 = vadd.f32 %v1994_v9, %v478_v43 }
  0xe2   : > { %v1983_v12 = vpop.f32.mrf.mxu1 }
  0xe3   : > { %v624_v15 = vpop.f32.mrf.mxu0  ;;  %v488_v52 = vadd.f32 %v1983_v12, %v1969_v61  ;;  %v645_v59 = vadd.f32 %v614_v11, %v473_v48 }
  0xe4   : > { %v482_v14 = vpop.f32.mrf.mxu1 }
  0xe5   : > { %v2403_v17 = vpop.f32.mrf.mxu0  ;;  %v483_v54 = vadd.f32 %v482_v14, %v350_v63  ;;  %v648_v4 = vadd.f32 %v1997_v13, %v488_v52 }
  0xe6   : > { %v1986_v16 = vpop.f32.mrf.mxu1 }
  0xe7   : > { %v634_v19 = vpop.f32.mrf.mxu0  ;;  %v647_v6 = vadd.f32 %v624_v15, %v483_v54  ;;  %v498_v2 = vadd.f32 %v1986_v16, %v2399_v1 }
  0xe8   : > { %v492_v18 = vpop.f32.mrf.mxu1 }
  0xe9   : > { %v2019_v21 = vpop.f32.mrf.mxu0  ;;  %v493_v7 = vadd.f32 %v492_v18, %v2401_v3  ;;  %v650_v15 = vadd.f32 %v2403_v17, %v498_v2 }
  0xea   : > { %v2005_v20 = vpop.f32.mrf.mxu1 }
  0xeb   : > { %v906_v23 = vpop.f32.mrf.mxu0  ;;  %v795_v47 = vadd.f32 %v2005_v20, %v644_v42 }
  0xec   : > { %v755_v22 = vpop.f32.mrf.mxu1 }
  0xed   : > { %v2022_v25 = vpop.f32.mrf.mxu0  ;;  %v794_v53 = vadd.f32 %v755_v22, %v643_v46  ;;  %v946_v57 = vadd.f32 %v2019_v21, %v795_v47  ;;  %v649_v22 = vadd.f32 %v634_v19, %v493_v7 }
  0xee   : > { %v2008_v24 = vpop.f32.mrf.mxu1 }
  0xef   : > { %v916_v27 = vpop.f32.mrf.mxu0  ;;  %v797_v58 = vadd.f32 %v2008_v24, %v646_v51  ;;  %v945_v0 = vadd.f32 %v906_v23, %v794_v53 }
  0xf0   : > { %v765_v26 = vpop.f32.mrf.mxu1 }
  0xf1   : > { %v2025_v29 = vpop.f32.mrf.mxu0  ;;  %v796_v8 = vadd.f32 %v765_v26, %v645_v59  ;;  %v948_v63 = vadd.f32 %v2022_v25, %v797_v58 }
  0xf2   : > { %v2011_v28 = vpop.f32.mrf.mxu1 }
  0xf3   : > { %v926_v31 = vpop.f32.mrf.mxu0  ;;  %v799_v10 = vadd.f32 %v2011_v28, %v648_v4  ;;  %v947_v1 = vadd.f32 %v916_v27, %v796_v8 }
  0xf4   : > { %v775_v30 = vpop.f32.mrf.mxu1 }
  0xf5   : > { %v2405_v33 = vpop.f32.mrf.mxu0  ;;  %v798_v14 = vadd.f32 %v775_v30, %v647_v6  ;;  %v950_v18 = vadd.f32 %v2025_v29, %v799_v10 }
  0xf6   : > { %v2014_v32 = vpop.f32.mrf.mxu1 }
  0xf7   : > { %v2407_v35 = vpop.f32.mrf.mxu0  ;;  %v949_v25 = vadd.f32 %v926_v31, %v798_v14  ;;  %v801_v26 = vadd.f32 %v2014_v32, %v650_v15 }
  0xf8   : > { %v785_v34 = vpop.f32.mrf.mxu1 }
  0xf9   : > { %v2047_v38 = vpop.f32.mrf.mxu0  ;;  %v800_v28 = vadd.f32 %v785_v34, %v649_v22  ;;  %v952_v34 = vadd.f32 %v2405_v33, %v801_v26 }
  0xfa   : > { %v2033_v37 = vpop.f32.mrf.mxu1 }
  0xfb   : > { %v1207_v41 = vpop.f32.mrf.mxu0  ;;  %v1096_v5 = vadd.f32 %v2033_v37, %v946_v57 }
  0xfc   : > { %v1056_v40 = vpop.f32.mrf.mxu1 }
  0xfd   : > { %v2050_v45 = vpop.f32.mrf.mxu0  ;;  %v1095_v12 = vadd.f32 %v1056_v40, %v945_v0  ;;  %v1247_v13 = vadd.f32 %v2047_v38, %v1096_v5 }
  0xfe   : > { %v2036_v44 = vpop.f32.mrf.mxu1 }
  0xff   : > { %v1217_v50 = vpop.f32.mrf.mxu0  ;;  %v1098_v21 = vadd.f32 %v2036_v44, %v948_v63  ;;  %v1246_v23 = vadd.f32 %v1207_v41, %v1095_v12  ;;  %v951_v44 = vadd.f32 %v2407_v35, %v800_v28 }
 0x100   : > { %v1066_v49 = vpop.f32.mrf.mxu1 }
 0x101   : > { %v2053_v56 = vpop.f32.mrf.mxu0  ;;  %v1097_v30 = vadd.f32 %v1066_v49, %v947_v1  ;;  %v1249_v19 = vadd.f32 %v2050_v45, %v1098_v21 }
 0x102   : > { %v2039_v55 = vpop.f32.mrf.mxu1 }
 0x103   : > { %v1227_v62 = vpop.f32.mrf.mxu0  ;;  %v1100_v27 = vadd.f32 %v2039_v55, %v950_v18  ;;  %v1248_v41 = vadd.f32 %v1217_v50, %v1097_v30 }
 0x104   : > { %v1076_v60 = vpop.f32.mrf.mxu1 }
 0x105   : > { %v2411_v9 = vpop.f32.mrf.mxu0  ;;  %v1099_v40 = vadd.f32 %v1076_v60, %v949_v25  ;;  %v1251_v45 = vadd.f32 %v2053_v56, %v1100_v27 }
 0x106   : > { %v2042_v61 = vpop.f32.mrf.mxu1 }
 0x107   : > { %v2413_v20 = vpop.f32.mrf.mxu0  ;;  %v1102_v48 = vadd.f32 %v2042_v61, %v952_v34  ;;  %v1250_v33 = vadd.f32 %v1227_v62, %v1099_v40 }
 0x108   : > { %v1086_v11 = vpop.f32.mrf.mxu1 }
 0x109   : > { %v2075_v3 = vpop.f32.mrf.mxu0  ;;  %v1101_v55 = vadd.f32 %v1086_v11, %v951_v44  ;;  %v1253_v6 = vadd.f32 %v2411_v9, %v1102_v48 }
 0x10a   : > { %v2061_v16 = vpop.f32.mrf.mxu1 }
 0x10b   : > { %v1398_v24 = vadd.f32 %v2061_v16, %v1247_v13  ;;  %v1508_v17 = vpop.f32.mrf.mxu0  ;;  %v1252_v14 = vadd.f32 %v2413_v20, %v1101_v55 }
 0x10c   : > { %v1358_v36 = vpop.f32.mrf.mxu1 }
 0x10d   : > { %v1548_v37 = vadd.f32 %v2075_v3, %v1398_v24  ;;  %v1397_v29 = vadd.f32 %v1358_v36, %v1246_v23  ;;  %v2078_v39 = vpop.f32.mrf.mxu0 }
 0x10e   : > { %v2064_v38 = vpop.f32.mrf.mxu1 }
 0x10f   : > { %1557 = vst.msk [vmem:[%s2420_s18 + $0x8] sm:$0xff] %vm1555_vm2, %v1548_v37  ;;  %v1547_v31 = vadd.f32 %v1508_v17, %v1397_v29  ;;  %v1400_v32 = vadd.f32 %v2064_v38, %v1249_v19  ;;  %v1518_v43 = vpop.f32.mrf.mxu0  ;;  %v1588_v49 = vmul.f32 %v1548_v37, %v1548_v37  ;;  %v1565_v35 = vsel %vm1555_vm2, %v1548_v37, 0.0 }
 0x110   : > { %v1368_v42 = vpop.f32.mrf.mxu1 }
 0x111   : > { %1556 = vst.msk [vmem:[%s2420_s18] sm:$0xff] %vm1555_vm2, %v1547_v31  ;;  %v1587_v46 = vmul.f32 %v1547_v31, %v1547_v31  ;;  %v1550_v47 = vadd.f32 %v2078_v39, %v1400_v32  ;;  %v1564_v51 = vsel %vm1555_vm2, %v1547_v31, 0.0  ;;  %v1399_v52 = vadd.f32 %v1368_v42, %v1248_v41  ;;  %v2081_v54 = vpop.f32.mrf.mxu0 }
 0x112   : > { %v2067_v53 = vpop.f32.mrf.mxu1  ;;  %v1566_v60 = vadd.f32 %v1565_v35, %v1564_v51  ;;  %v1596_v62 = vsel %vm1555_vm2, %v1588_v49, 0.0 }
 0x113   : > { %1559 = vst.msk [vmem:[%s2420_s18 + $0x18] sm:$0xff] %vm1555_vm2, %v1550_v47  ;;  %v1402_v50 = vadd.f32 %v2067_v53, %v1251_v45  ;;  %v1595_v56 = vsel %vm1555_vm2, %v1587_v46, 0.0  ;;  %v1549_v57 = vadd.f32 %v1518_v43, %v1399_v52  ;;  %v1528_v59 = vpop.f32.mrf.mxu0  ;;  %v1590_v4 = vmul.f32 %v1550_v47, %v1550_v47 }
 0x114   : > { %v1378_v58 = vpop.f32.mrf.mxu1  ;;  %v1597_v61 = vadd.f32 %v1596_v62, %v1595_v56  ;;  %v1569_v11 = vsel %vm1555_vm2, %v1550_v47, 0.0 }
 0x115   : > { %v1552_v0 = vadd.f32 %v2081_v54, %v1402_v50  ;;  %v1401_v5 = vadd.f32 %v1378_v58, %v1250_v33  ;;  %1558 = vst.msk [vmem:[%s2420_s18 + $0x10] sm:$0xff] %vm1555_vm2, %v1549_v57  ;;  %v1567_v2 = vsel %vm1555_vm2, %v1549_v57, 0.0  ;;  %v1589_v7 = vmul.f32 %v1549_v57, %v1549_v57  ;;  %v2084_v12 = vpop.f32.mrf.mxu0 }
 0x116   : > { %v2070_v8 = vpop.f32.mrf.mxu1  ;;  %v1568_v63 = vadd.f32 %v1567_v2, %v1566_v60  ;;  %v1600_v15 = vsel %vm1555_vm2, %v1590_v4, 0.0 }
 0x117   : > { %1561 = vst.msk [vmem:[%s2420_s18 + $0x28] sm:$0xff] %vm1555_vm2, %v1552_v0  ;;  %v1551_v10 = vadd.f32 %v1528_v59, %v1401_v5  ;;  %v1598_v9 = vsel %vm1555_vm2, %v1589_v7, 0.0  ;;  %v1404_v13 = vadd.f32 %v2070_v8, %v1253_v6  ;;  %v1592_v3 = vmul.f32 %v1552_v0, %v1552_v0  ;;  %v1538_v26 = vpop.f32.mrf.mxu0 }
 0x118   : > { %v1388_v21 = vpop.f32.mrf.mxu1  ;;  %v1599_v22 = vadd.f32 %v1598_v9, %v1597_v61  ;;  %v1570_v1 = vadd.f32 %v1569_v11, %v1568_v63  ;;  %v1573_v28 = vsel %vm1555_vm2, %v1552_v0, 0.0 }
 0x119   : > { %1560 = vst.msk [vmem:[%s2420_s18 + $0x20] sm:$0xff] %vm1555_vm2, %v1551_v10  ;;  %v1571_v16 = vsel %vm1555_vm2, %v1551_v10, 0.0  ;;  %v1591_v18 = vmul.f32 %v1551_v10, %v1551_v10  ;;  %v1554_v23 = vadd.f32 %v2084_v12, %v1404_v13  ;;  %v1403_v20 = vadd.f32 %v1388_v21, %v1252_v14 }
 0x11a   : > { %v1572_v24 = vadd.f32 %v1571_v16, %v1570_v1  ;;  %v1601_v25 = vadd.f32 %v1600_v15, %v1599_v22  ;;  %v1604_v27 = vsel %vm1555_vm2, %v1592_v3, 0.0 }
 0x11b   : > { %v1602_v30 = vsel %vm1555_vm2, %v1591_v18, 0.0  ;;  %1563 = vst.msk [vmem:[%s2420_s18 + $0x38] sm:$0xff] %vm1555_vm2, %v1554_v23  ;;  %v1553_v36 = vadd.f32 %v1538_v26, %v1403_v20  ;;  %v1594_v37 = vmul.f32 %v1554_v23, %v1554_v23  ;;  %v1577_v31 = vsel %vm1555_vm2, %v1554_v23, 0.0 }
 0x11c   : > { %v1603_v17 = vadd.f32 %v1602_v30, %v1601_v25  ;;  %v1574_v19 = vadd.f32 %v1573_v28, %v1572_v24 }
 0x11d   : > { %1562 = vst.msk [vmem:[%s2420_s18 + $0x30] sm:$0xff] %vm1555_vm2, %v1553_v36  ;;  %v1575_v29 = vsel %vm1555_vm2, %v1553_v36, 0.0  ;;  %v1593_v38 = vmul.f32 %v1553_v36, %v1553_v36  ;;  %v1608_v42 = vsel %vm1555_vm2, %v1594_v37, 0.0 }
 0x11e   : > { %v1576_v39 = vadd.f32 %v1575_v29, %v1574_v19  ;;  %v1605_v40 = vadd.f32 %v1604_v27, %v1603_v17 }
 0x11f   : > { %v1606_v32 = vsel %vm1555_vm2, %v1593_v38, 0.0 }
 0x120   : > { %v1578_v34 = vadd.f32 %v1577_v31, %v1576_v39  ;;  %v1607_v41 = vadd.f32 %v1606_v32, %v1605_v40 }
 0x122   : > { %v1579_v43 = vrot.slane %v1578_v34, 4  ;;  %v1609_v44 = vadd.f32 %v1608_v42, %v1607_v41 }
 0x124   : > { %v1580_v45 = vadd.f32 %v1579_v43, %v1578_v34  ;;  %v1610_v46 = vrot.slane %v1609_v44, 4 }
 0x126   : > { %v1581_v47 = vrot.slane %v1580_v45, 2  ;;  %v1611_v48 = vadd.f32 %v1610_v46, %v1609_v44 }
 0x128   : > { %v1582_v49 = vadd.f32 %v1581_v47, %v1580_v45  ;;  %v1612_v51 = vrot.slane %v1611_v48, 2 }
 0x12a   : > { %v1583_v52 = vrot.slane %v1582_v49, 1  ;;  %v1613_v53 = vadd.f32 %v1612_v51, %v1611_v48 }
 0x12c   : > { %v1584_v54 = vadd.f32 %v1583_v52, %v1582_v49  ;;  %v1614_v33 = vrot.slane %v1613_v53, 1 }
 0x12e   : > { %1586 = vst.msk [vmem:[%s211_s21] sm:$0x1] %vm1585_vm3, %v1584_v54  ;;  %v1615_v50 = vadd.f32 %v1614_v33, %v1613_v53 }
 0x130   : > { %1616 = vst.msk [vmem:[%s214_s24] sm:$0x1] %vm1585_vm3, %v1615_v50 }
 0x131 PF: > { %s15_s15 = sadd.s32 1, %s2102_s15  }
 0x132   : > { %p12_p4 = scmp.ge.s32.totalorder %s15_s15, 4  }
 0x134   :  { %14 = sbr.rel (!%p12_p4) target bundleno = 1 (0x1), region = 95 }

// kernel: a_call__.7
= control target key start
LH: loop header
LB: loop body
LE: loop exit
PB: predicated region body
PF: predicated region fallthrough
CT: control target
= control target key end

     0   :  { %s2080_s15 = smov 0   ;;  %s2340_s0 = inlined_call_operand.vmem [shape: f32[2,1,10,10,8], index: 0, kind: input, shape index: {}]   ;;  %s2341_s1 = inlined_call_operand.vmem [shape: f32[3,3,8,8], index: 1, kind: input, shape index: {}]   ;;  %s2342_s2 = inlined_call_operand.vmem [shape: f32[2,64,8], index: 2, kind: output, shape index: {0}]   ;;  %s2343_s3 = inlined_call_operand.vmem [shape: f32[2,1,8], index: 3, kind: output, shape index: {1}]   ;;  %s2344_s4 = inlined_call_operand.vmem [shape: f32[2,1,8], index: 4, kind: output, shape index: {2}]  }
   0x1 LB: > { %s1690_s16 = sadd.s32 4294967295, %s2053_s15   ;;  %p1694_p0 = scmp.ge.s32.totalorder %s2053_s15, 1  ;;  %s2053_s15 = sphi %s2080_s15, %s15_s15  }
   0x2   : > { %p167_p1 = scmp.lt.s32.totalorder %s2053_s15, 3 }
   0x4   : > { %p168_p2 = pnand %p1694_p0, %p167_p1 }
   0x5   : > { %p199_p3 = scmp.lt.s32.totalorder (!%p168_p2), %s1690_s16, 1 }
   0x6   : > { %171 = sbr.rel (%p168_p2) target bundleno = 305 (0x131), region = 28 }
   0xb   : > { %v1698_v0 = vld [vmem:[%s2341_s1 + $0x8] sm:$0xff]  ;;  %v223_v1 = vld [vmem:[%s2341_s1] sm:$0xff]  ;;  %v1715_v2 = vld [vmem:[%s2341_s1 + $0x10] sm:$0xff]  ;;  %s2346_s16 = smov (!%p199_p3, %s1690_s16), 1  ;;  %vm234_vm0 = vcmask 64512   ;;  %vm1553_vm1 = vcmask 57344  }
   0xc   : > { %2036 = vmatprep.subr.mxu1 %v1698_v0  ;;  %1910 = vmatprep.subr.mxu0 %v1698_v0  ;;  %s2038_s23 = smul.u32 160, %s2346_s16  ;;  %v1732_v9 = vld [vmem:[%s2341_s1 + $0x18] sm:$0xff]  ;;  %v1749_v10 = vld [vmem:[%s2341_s1 + $0x20] sm:$0xff]  ;;  %v1766_v19 = vld [vmem:[%s2341_s1 + $0x28] sm:$0xff]  ;;  %s1828_s13 = sshll.u32 %s2346_s16, 6 }
   0xd   : > { %2037 = vmatpush3.msra.mxu1 %v1698_v0  ;;  %1911 = vmatpush3.msra.mxu0 %v1698_v0  ;;  %v1783_v20 = vld [vmem:[%s2341_s1 + $0x30] sm:$0xff]  ;;  %v1800_v31 = vld [vmem:[%s2341_s1 + $0x38] sm:$0xff]  ;;  %v1817_v32 = vld [vmem:[%s2341_s1 + $0x40] sm:$0xff]  ;;  %s2291_s18 = scalar_lea.vmem %s2342_s2, %s1828_s13  ;;  %s211_s21 = scalar_lea.vmem %s2343_s3, %s2346_s16 }
   0xe   : > { %1924 = vmatprep.subr.mxu1 %v223_v1  ;;  %1938 = vmatprep.subr.mxu0 %v1715_v2  ;;  %s2103_s26 = scalar_lea.vmem %s2340_s0, %s2038_s23  ;;  %s214_s24 = scalar_lea.vmem %s2344_s4, %s2346_s16 }
   0xf   : > { %v224_v3 = vld [vmem:[%s2103_s26 + $0x1] sm:$0xff]  ;;  %v225_v5 = vld [vmem:[%s2103_s26 + $0x11] sm:$0xff] }
  0x10   : > { %v2107_v4 = vld [vmem:[%s2103_s26 + $0x41] sm:$0xff]  ;;  %1912 = vmatprep.mubr.msk.f32.mxu0 %vm234_vm0, %v224_v3  ;;  %v2114_v6 = vld [vmem:[%s2103_s26 + $0x51] sm:$0xff] }
  0x11   : > { %1918 = vmatprep.mubr.msk.f32.mxu1 %vm234_vm0, %v2107_v4  ;;  %v2117_v7 = vld [vmem:[%s2103_s26 + $0x21] sm:$0xff]  ;;  %1913 = vmatmul.mubr.msk.f32.vlgmr.msra.gmra.mxu0 %vm234_vm0, %v225_v5  ;;  %v2132_v11 = vld [vmem:[%s2103_s26 + $0x31] sm:$0xff] }
  0x12   : > { %v2120_v8 = vld [vmem:[%s2103_s26 + $0x61] sm:$0xff]  ;;  %1919 = vmatmul.mubr.msk.f32.vlgmr.msra.gmra.mxu1 %vm234_vm0, %v2114_v6  ;;  %1939 = vmatpush3.msra.mxu0 %v1715_v2  ;;  %v2135_v12 = vld [vmem:[%s2103_s26 + $0x71] sm:$0xff] }
  0x13   : > { %1925 = vmatpush3.msra.mxu1 %v223_v1  ;;  %1915 = vmatprep.mubr.msk.f32.mxu0 %vm234_vm0, %v2117_v7  ;;  %v215_v13 = vld [vmem:[%s2103_s26] sm:$0xff]  ;;  %v216_v15 = vld [vmem:[%s2103_s26 + $0x10] sm:$0xff] }
  0x14   : > { %1921 = vmatprep.mubr.msk.f32.mxu1 %vm234_vm0, %v2120_v8  ;;  %v493_v14 = vld [vmem:[%s2103_s26 + $0x2] sm:$0xff]  ;;  %1952 = vmatprep.subr.mxu1 %v1732_v9  ;;  %v494_v16 = vld [vmem:[%s2103_s26 + $0x12] sm:$0xff] }
  0x15   : > { %1966 = vmatprep.subr.mxu0 %v1749_v10  ;;  %1916 = vmatmul.mubr.msk.f32.gmra.mxu0 %vm234_vm0, %v2132_v11  ;;  %v217_v17 = vld [vmem:[%s2103_s26 + $0x20] sm:$0xff]  ;;  %v218_v21 = vld [vmem:[%s2103_s26 + $0x30] sm:$0xff] }
  0x16   : > { %1922 = vmatmul.mubr.msk.f32.gmra.mxu1 %vm234_vm0, %v2135_v12  ;;  %1940 = vmatprep.mubr.msk.f32.mxu0 %vm234_vm0, %v493_v14  ;;  %v2153_v18 = vld [vmem:[%s2103_s26 + $0x22] sm:$0xff]  ;;  %v2165_v22 = vld [vmem:[%s2103_s26 + $0x32] sm:$0xff] }
  0x17   : > { %1926 = vmatprep.mubr.msk.f32.mxu1 %vm234_vm0, %v215_v13  ;;  %v219_v23 = vld [vmem:[%s2103_s26 + $0x40] sm:$0xff]  ;;  %v220_v25 = vld [vmem:[%s2103_s26 + $0x50] sm:$0xff] }
  0x18   : > { %v2172_v24 = vld [vmem:[%s2103_s26 + $0x42] sm:$0xff]  ;;  %v498_v26 = vld [vmem:[%s2103_s26 + $0x52] sm:$0xff] }
  0x19   : > { %1941 = vmatmul.mubr.msk.f32.vlgmr.msra.gmra.mxu0 %vm234_vm0, %v494_v16  ;;  %v221_v27 = vld [vmem:[%s2103_s26 + $0x60] sm:$0xff]  ;;  %v222_v29 = vld [vmem:[%s2103_s26 + $0x70] sm:$0xff] }
  0x1a   : > { %1927 = vmatmul.mubr.msk.f32.vlgmr.msra.gmra.mxu1 %vm234_vm0, %v216_v15  ;;  %1967 = vmatpush3.msra.mxu0 %v1749_v10  ;;  %v499_v28 = vld [vmem:[%s2103_s26 + $0x62] sm:$0xff]  ;;  %v500_v30 = vld [vmem:[%s2103_s26 + $0x72] sm:$0xff] }
  0x1b   : > { %1953 = vmatpush3.msra.mxu1 %v1732_v9  ;;  %1929 = vmatprep.mubr.msk.f32.mxu1 %vm234_vm0, %v217_v17  ;;  %v1731_v33 = vld [vmem:[%s2103_s26 + $0x80] sm:$0xff]  ;;  %v1782_v36 = vld [vmem:[%s2103_s26 + $0x90] sm:$0xff] }
  0x1c   : > { %1943 = vmatprep.mubr.msk.f32.mxu0 %vm234_vm0, %v2153_v18  ;;  %1980 = vmatprep.subr.mxu1 %v1766_v19  ;;  %v1748_v34 = vld [vmem:[%s2103_s26 + $0x81] sm:$0xff]  ;;  %v1799_v37 = vld [vmem:[%s2103_s26 + $0x91] sm:$0xff] }
  0x1d   : > { %1994 = vmatprep.subr.mxu0 %v1783_v20  ;;  %1944 = vmatmul.mubr.msk.f32.gmra.mxu0 %vm234_vm0, %v2165_v22  ;;  %v1765_v35 = vld [vmem:[%s2103_s26 + $0x82] sm:$0xff]  ;;  %v1816_v38 = vld [vmem:[%s2103_s26 + $0x92] sm:$0xff] }
  0x1e   : > { %1930 = vmatmul.mubr.msk.f32.gmra.mxu1 %vm234_vm0, %v218_v21  ;;  %1946 = vmatprep.mubr.msk.f32.mxu0 %vm234_vm0, %v2172_v24 }
  0x1f   : > { %1932 = vmatprep.mubr.msk.f32.mxu1 %vm234_vm0, %v219_v23 }
  0x21   : > { %1947 = vmatmul.mubr.msk.f32.gmra.mxu0 %vm234_vm0, %v498_v26 }
  0x22   : > { %1933 = vmatmul.mubr.msk.f32.gmra.mxu1 %vm234_vm0, %v220_v25  ;;  %1949 = vmatprep.mubr.msk.f32.mxu0 %vm234_vm0, %v499_v28 }
  0x23   : > { %1935 = vmatprep.mubr.msk.f32.mxu1 %vm234_vm0, %v221_v27 }
  0x25   : > { %1950 = vmatmul.mubr.msk.f32.gmra.mxu0 %vm234_vm0, %v500_v30 }
  0x26   : > { %1936 = vmatmul.mubr.msk.f32.gmra.mxu1 %vm234_vm0, %v222_v29  ;;  %1968 = vmatprep.mubr.msk.f32.mxu0 %vm234_vm0, %v225_v5 }
  0x27   : > { %1954 = vmatprep.mubr.msk.f32.mxu1 %vm234_vm0, %v216_v15 }
  0x29   : > { %1969 = vmatmul.mubr.msk.f32.vlgmr.msra.gmra.mxu0 %vm234_vm0, %v2117_v7 }
  0x2a   : > { %1955 = vmatmul.mubr.msk.f32.vlgmr.msra.gmra.mxu1 %vm234_vm0, %v217_v17  ;;  %1995 = vmatpush3.msra.mxu0 %v1783_v20 }
  0x2b   : > { %1981 = vmatpush3.msra.mxu1 %v1766_v19  ;;  %1957 = vmatprep.mubr.msk.f32.mxu1 %vm234_vm0, %v218_v21 }
  0x2c   : > { %1971 = vmatprep.mubr.msk.f32.mxu0 %vm234_vm0, %v2132_v11  ;;  %2008 = vmatprep.subr.mxu1 %v1800_v31 }
  0x2d   : > { %2022 = vmatprep.subr.mxu0 %v1817_v32  ;;  %1972 = vmatmul.mubr.msk.f32.gmra.mxu0 %vm234_vm0, %v2107_v4 }
  0x2e   : > { %1958 = vmatmul.mubr.msk.f32.gmra.mxu1 %vm234_vm0, %v219_v23  ;;  %1974 = vmatprep.mubr.msk.f32.mxu0 %vm234_vm0, %v2114_v6 }
  0x2f   : > { %1960 = vmatprep.mubr.msk.f32.mxu1 %vm234_vm0, %v220_v25 }
  0x31   : > { %1975 = vmatmul.mubr.msk.f32.gmra.mxu0 %vm234_vm0, %v2120_v8 }
  0x32   : > { %1961 = vmatmul.mubr.msk.f32.gmra.mxu1 %vm234_vm0, %v221_v27  ;;  %1977 = vmatprep.mubr.msk.f32.mxu0 %vm234_vm0, %v2135_v12 }
  0x33   : > { %1963 = vmatprep.mubr.msk.f32.mxu1 %vm234_vm0, %v222_v29 }
  0x35   : > { %1978 = vmatmul.mubr.msk.f32.gmra.mxu0 %vm234_vm0, %v1748_v34 }
  0x36   : > { %1964 = vmatmul.mubr.msk.f32.gmra.mxu1 %vm234_vm0, %v1731_v33  ;;  %1996 = vmatprep.mubr.msk.f32.mxu0 %vm234_vm0, %v217_v17 }
  0x37   : > { %1982 = vmatprep.mubr.msk.f32.mxu1 %vm234_vm0, %v494_v16 }
  0x39   : > { %1997 = vmatmul.mubr.msk.f32.vlgmr.msra.gmra.mxu0 %vm234_vm0, %v218_v21 }
  0x3a   : > { %1983 = vmatmul.mubr.msk.f32.vlgmr.msra.gmra.mxu1 %vm234_vm0, %v2153_v18  ;;  %2023 = vmatpush3.msra.mxu0 %v1817_v32 }
  0x3b   : > { %2009 = vmatpush3.msra.mxu1 %v1800_v31  ;;  %1985 = vmatprep.mubr.msk.f32.mxu1 %vm234_vm0, %v2165_v22 }
  0x3c   : > { %1999 = vmatprep.mubr.msk.f32.mxu0 %vm234_vm0, %v219_v23 }
  0x3d   : > { %2000 = vmatmul.mubr.msk.f32.gmra.mxu0 %vm234_vm0, %v220_v25 }
  0x3e   : > { %1986 = vmatmul.mubr.msk.f32.gmra.mxu1 %vm234_vm0, %v2172_v24  ;;  %2002 = vmatprep.mubr.msk.f32.mxu0 %vm234_vm0, %v221_v27 }
  0x3f   : > { %1988 = vmatprep.mubr.msk.f32.mxu1 %vm234_vm0, %v498_v26 }
  0x41   : > { %2003 = vmatmul.mubr.msk.f32.gmra.mxu0 %vm234_vm0, %v222_v29 }
  0x42   : > { %1989 = vmatmul.mubr.msk.f32.gmra.mxu1 %vm234_vm0, %v499_v28  ;;  %2005 = vmatprep.mubr.msk.f32.mxu0 %vm234_vm0, %v1731_v33 }
  0x43   : > { %1991 = vmatprep.mubr.msk.f32.mxu1 %vm234_vm0, %v500_v30 }
  0x45   : > { %2006 = vmatmul.mubr.msk.f32.gmra.mxu0 %vm234_vm0, %v1782_v36 }
  0x46   : > { %1992 = vmatmul.mubr.msk.f32.gmra.mxu1 %vm234_vm0, %v1765_v35  ;;  %2024 = vmatprep.mubr.msk.f32.mxu0 %vm234_vm0, %v2153_v18 }
  0x47   : > { %2010 = vmatprep.mubr.msk.f32.mxu1 %vm234_vm0, %v2117_v7 }
  0x49   : > { %2025 = vmatmul.mubr.msk.f32.vlgmr.msra.gmra.mxu0 %vm234_vm0, %v2165_v22 }
  0x4a   : > { %2011 = vmatmul.mubr.msk.f32.vlgmr.msra.gmra.mxu1 %vm234_vm0, %v2132_v11  ;;  %2027 = vmatprep.mubr.msk.f32.mxu0 %vm234_vm0, %v2172_v24 }
  0x4b   : > { %2013 = vmatprep.mubr.msk.f32.mxu1 %vm234_vm0, %v2107_v4 }
  0x4d   : > { %2028 = vmatmul.mubr.msk.f32.gmra.mxu0 %vm234_vm0, %v498_v26 }
  0x4e   : > { %2014 = vmatmul.mubr.msk.f32.gmra.mxu1 %vm234_vm0, %v2114_v6  ;;  %2030 = vmatprep.mubr.msk.f32.mxu0 %vm234_vm0, %v499_v28 }
  0x4f   : > { %2016 = vmatprep.mubr.msk.f32.mxu1 %vm234_vm0, %v2120_v8 }
  0x51   : > { %2031 = vmatmul.mubr.msk.f32.gmra.mxu0 %vm234_vm0, %v500_v30 }
  0x52   : > { %2017 = vmatmul.mubr.msk.f32.gmra.mxu1 %vm234_vm0, %v2135_v12  ;;  %2033 = vmatprep.mubr.msk.f32.mxu0 %vm234_vm0, %v1765_v35 }
  0x53   : > { %2019 = vmatprep.mubr.msk.f32.mxu1 %vm234_vm0, %v1748_v34 }
  0x55   : > { %2034 = vmatmul.mubr.msk.f32.gmra.mxu0 %vm234_vm0, %v1816_v38 }
  0x56   : > { %2020 = vmatmul.mubr.msk.f32.gmra.mxu1 %vm234_vm0, %v1799_v37 }
  0xd1   : > { %v1914_v39 = vpop.f32.mrf.mxu0 }
  0xd2   : > { %v1920_v40 = vpop.f32.mrf.mxu1 }
  0xd3   : > { %v325_v41 = vpop.f32.mrf.mxu0 }
  0xd4   : > { %v345_v42 = vpop.f32.mrf.mxu1 }
  0xd5   : > { %v1917_v43 = vpop.f32.mrf.mxu0 }
  0xd6   : > { %v2270_v44 = vpop.f32.mrf.mxu1 }
  0xd7   : > { %v335_v45 = vpop.f32.mrf.mxu0 }
  0xd8   : > { %v2272_v46 = vpop.f32.mrf.mxu1 }
  0xd9   : > { %v1942_v48 = vpop.f32.mrf.mxu0 }
  0xda   : > { %v1928_v47 = vpop.f32.mrf.mxu1 }
  0xdb   : > { %v593_v50 = vpop.f32.mrf.mxu0  ;;  %v460_v15 = vadd.f32 %v1928_v47, %v1914_v39 }
  0xdc   : > { %v454_v49 = vpop.f32.mrf.mxu1 }
  0xdd   : > { %v1945_v52 = vpop.f32.mrf.mxu0  ;;  %v455_v18 = vadd.f32 %v454_v49, %v325_v41  ;;  %v633_v21 = vadd.f32 %v1942_v48, %v460_v15 }
  0xde   : > { %v1931_v51 = vpop.f32.mrf.mxu1 }
  0xdf   : > { %v603_v54 = vpop.f32.mrf.mxu0  ;;  %v470_v22 = vadd.f32 %v1931_v51, %v1917_v43  ;;  %v632_v25 = vadd.f32 %v593_v50, %v455_v18 }
  0xe0   : > { %v464_v53 = vpop.f32.mrf.mxu1 }
  0xe1   : > { %v1948_v56 = vpop.f32.mrf.mxu0  ;;  %v465_v27 = vadd.f32 %v464_v53, %v335_v45  ;;  %v635_v30 = vadd.f32 %v1945_v52, %v470_v22 }
  0xe2   : > { %v1934_v55 = vpop.f32.mrf.mxu1 }
  0xe3   : > { %v613_v58 = vpop.f32.mrf.mxu0  ;;  %v480_v31 = vadd.f32 %v1934_v55, %v1920_v40  ;;  %v634_v38 = vadd.f32 %v603_v54, %v465_v27 }
  0xe4   : > { %v474_v57 = vpop.f32.mrf.mxu1 }
  0xe5   : > { %v2274_v60 = vpop.f32.mrf.mxu0  ;;  %v475_v33 = vadd.f32 %v474_v57, %v345_v42  ;;  %v637_v47 = vadd.f32 %v1948_v56, %v480_v31 }
  0xe6   : > { %v1937_v59 = vpop.f32.mrf.mxu1 }
  0xe7   : > { %v623_v62 = vpop.f32.mrf.mxu0  ;;  %v636_v49 = vadd.f32 %v613_v58, %v475_v33  ;;  %v490_v45 = vadd.f32 %v1937_v59, %v2270_v44 }
  0xe8   : > { %v484_v61 = vpop.f32.mrf.mxu1 }
  0xe9   : > { %v1970_v0 = vpop.f32.mrf.mxu0  ;;  %v485_v50 = vadd.f32 %v484_v61, %v2272_v46  ;;  %v639_v58 = vadd.f32 %v2274_v60, %v490_v45 }
  0xea   : > { %v1956_v63 = vpop.f32.mrf.mxu1 }
  0xeb   : > { %v888_v2 = vpop.f32.mrf.mxu0  ;;  %v781_v26 = vadd.f32 %v1956_v63, %v633_v21 }
  0xec   : > { %v741_v1 = vpop.f32.mrf.mxu1 }
  0xed   : > { %v1973_v4 = vpop.f32.mrf.mxu0  ;;  %v780_v32 = vadd.f32 %v741_v1, %v632_v25  ;;  %v928_v36 = vadd.f32 %v1970_v0, %v781_v26  ;;  %v638_v1 = vadd.f32 %v623_v62, %v485_v50 }
  0xee   : > { %v1959_v3 = vpop.f32.mrf.mxu1 }
  0xef   : > { %v898_v6 = vpop.f32.mrf.mxu0  ;;  %v783_v37 = vadd.f32 %v1959_v3, %v635_v30  ;;  %v927_v43 = vadd.f32 %v888_v2, %v780_v32 }
  0xf0   : > { %v751_v5 = vpop.f32.mrf.mxu1 }
  0xf1   : > { %v1976_v8 = vpop.f32.mrf.mxu0  ;;  %v782_v51 = vadd.f32 %v751_v5, %v634_v38  ;;  %v930_v42 = vadd.f32 %v1973_v4, %v783_v37 }
  0xf2   : > { %v1962_v7 = vpop.f32.mrf.mxu1 }
  0xf3   : > { %v908_v10 = vpop.f32.mrf.mxu0  ;;  %v785_v53 = vadd.f32 %v1962_v7, %v637_v47  ;;  %v929_v44 = vadd.f32 %v898_v6, %v782_v51 }
  0xf4   : > { %v761_v9 = vpop.f32.mrf.mxu1 }
  0xf5   : > { %v2276_v12 = vpop.f32.mrf.mxu0  ;;  %v784_v57 = vadd.f32 %v761_v9, %v636_v49  ;;  %v932_v61 = vadd.f32 %v1976_v8, %v785_v53 }
  0xf6   : > { %v1965_v11 = vpop.f32.mrf.mxu1 }
  0xf7   : > { %v2278_v14 = vpop.f32.mrf.mxu0  ;;  %v931_v5 = vadd.f32 %v908_v10, %v784_v57  ;;  %v787_v4 = vadd.f32 %v1965_v11, %v639_v58 }
  0xf8   : > { %v771_v13 = vpop.f32.mrf.mxu1 }
  0xf9   : > { %v1998_v17 = vpop.f32.mrf.mxu0  ;;  %v786_v7 = vadd.f32 %v771_v13, %v638_v1  ;;  %v934_v13 = vadd.f32 %v2276_v12, %v787_v4 }
  0xfa   : > { %v1984_v16 = vpop.f32.mrf.mxu1 }
  0xfb   : > { %v1183_v20 = vpop.f32.mrf.mxu0  ;;  %v1075_v48 = vadd.f32 %v1984_v16, %v928_v36 }
  0xfc   : > { %v1035_v19 = vpop.f32.mrf.mxu1 }
  0xfd   : > { %v2001_v24 = vpop.f32.mrf.mxu0  ;;  %v1074_v55 = vadd.f32 %v1035_v19, %v927_v43  ;;  %v1223_v56 = vadd.f32 %v1998_v17, %v1075_v48 }
  0xfe   : > { %v1987_v23 = vpop.f32.mrf.mxu1 }
  0xff   : > { %v1193_v29 = vpop.f32.mrf.mxu0  ;;  %v1077_v0 = vadd.f32 %v1987_v23, %v930_v42  ;;  %v1222_v2 = vadd.f32 %v1183_v20, %v1074_v55  ;;  %v933_v23 = vadd.f32 %v2278_v14, %v786_v7 }
 0x100   : > { %v1045_v28 = vpop.f32.mrf.mxu1 }
 0x101   : > { %v2004_v35 = vpop.f32.mrf.mxu0  ;;  %v1076_v15 = vadd.f32 %v1045_v28, %v929_v44  ;;  %v1225_v60 = vadd.f32 %v2001_v24, %v1077_v0 }
 0x102   : > { %v1990_v34 = vpop.f32.mrf.mxu1 }
 0x103   : > { %v1203_v41 = vpop.f32.mrf.mxu0  ;;  %v1079_v62 = vadd.f32 %v1990_v34, %v932_v61  ;;  %v1224_v20 = vadd.f32 %v1193_v29, %v1076_v15 }
 0x104   : > { %v1055_v39 = vpop.f32.mrf.mxu1 }
 0x105   : > { %v2282_v52 = vpop.f32.mrf.mxu0  ;;  %v1078_v19 = vadd.f32 %v1055_v39, %v931_v5  ;;  %v1227_v24 = vadd.f32 %v2004_v35, %v1079_v62 }
 0x106   : > { %v1993_v40 = vpop.f32.mrf.mxu1 }
 0x107   : > { %v2284_v63 = vpop.f32.mrf.mxu0  ;;  %v1081_v27 = vadd.f32 %v1993_v40, %v934_v13  ;;  %v1226_v12 = vadd.f32 %v1203_v41, %v1078_v19 }
 0x108   : > { %v1065_v54 = vpop.f32.mrf.mxu1 }
 0x109   : > { %v2026_v46 = vpop.f32.mrf.mxu0  ;;  %v1080_v34 = vadd.f32 %v1065_v54, %v933_v23  ;;  %v1229_v49 = vadd.f32 %v2282_v52, %v1081_v27 }
 0x10a   : > { %v2012_v59 = vpop.f32.mrf.mxu1 }
 0x10b   : > { %v1370_v3 = vadd.f32 %v2012_v59, %v1223_v56  ;;  %v1477_v16 = vpop.f32.mrf.mxu0  ;;  %v1228_v57 = vadd.f32 %v2284_v63, %v1080_v34 }
 0x10c   : > { %v1330_v9 = vpop.f32.mrf.mxu1 }
 0x10d   : > { %v1517_v6 = vadd.f32 %v2026_v46, %v1370_v3  ;;  %v1369_v17 = vadd.f32 %v1330_v9, %v1222_v2  ;;  %v2029_v18 = vpop.f32.mrf.mxu0 }
 0x10e   : > { %v2015_v8 = vpop.f32.mrf.mxu1 }
 0x10f   : > { %1525 = vst.msk [vmem:[%s2291_s18 + $0x8] sm:$0xff] %vm234_vm0, %v1517_v6  ;;  %v1516_v10 = vadd.f32 %v1477_v16, %v1369_v17  ;;  %v1372_v11 = vadd.f32 %v2015_v8, %v1225_v60  ;;  %v1487_v22 = vpop.f32.mrf.mxu0  ;;  %v1556_v28 = vmul.f32 %v1517_v6, %v1517_v6  ;;  %v1533_v14 = vsel %vm234_vm0, %v1517_v6, 0.0 }
 0x110   : > { %v1340_v21 = vpop.f32.mrf.mxu1 }
 0x111   : > { %1524 = vst.msk [vmem:[%s2291_s18] sm:$0xff] %vm234_vm0, %v1516_v10  ;;  %v1555_v25 = vmul.f32 %v1516_v10, %v1516_v10  ;;  %v1519_v26 = vadd.f32 %v2029_v18, %v1372_v11  ;;  %v1532_v30 = vsel %vm234_vm0, %v1516_v10, 0.0  ;;  %v1371_v31 = vadd.f32 %v1340_v21, %v1224_v20  ;;  %v2032_v33 = vpop.f32.mrf.mxu0 }
 0x112   : > { %v2018_v32 = vpop.f32.mrf.mxu1  ;;  %v1534_v39 = vadd.f32 %v1533_v14, %v1532_v30  ;;  %v1564_v41 = vsel %vm234_vm0, %v1556_v28, 0.0 }
 0x113   : > { %1527 = vst.msk [vmem:[%s2291_s18 + $0x18] sm:$0xff] %vm234_vm0, %v1519_v26  ;;  %v1374_v29 = vadd.f32 %v2018_v32, %v1227_v24  ;;  %v1563_v35 = vsel %vm234_vm0, %v1555_v25, 0.0  ;;  %v1518_v36 = vadd.f32 %v1487_v22, %v1371_v31  ;;  %v1497_v38 = vpop.f32.mrf.mxu0  ;;  %v1558_v47 = vmul.f32 %v1519_v26, %v1519_v26 }
 0x114   : > { %v1350_v37 = vpop.f32.mrf.mxu1  ;;  %v1565_v40 = vadd.f32 %v1564_v41, %v1563_v35  ;;  %v1537_v54 = vsel %vm234_vm0, %v1519_v26, 0.0 }
 0x115   : > { %v1521_v43 = vadd.f32 %v2032_v33, %v1374_v29  ;;  %v1373_v48 = vadd.f32 %v1350_v37, %v1226_v12  ;;  %1526 = vst.msk [vmem:[%s2291_s18 + $0x10] sm:$0xff] %vm234_vm0, %v1518_v36  ;;  %v1535_v45 = vsel %vm234_vm0, %v1518_v36, 0.0  ;;  %v1557_v50 = vmul.f32 %v1518_v36, %v1518_v36  ;;  %v2035_v55 = vpop.f32.mrf.mxu0 }
 0x116   : > { %v2021_v51 = vpop.f32.mrf.mxu1  ;;  %v1536_v42 = vadd.f32 %v1535_v45, %v1534_v39  ;;  %v1568_v58 = vsel %vm234_vm0, %v1558_v47, 0.0 }
 0x117   : > { %1529 = vst.msk [vmem:[%s2291_s18 + $0x28] sm:$0xff] %vm234_vm0, %v1521_v43  ;;  %v1520_v53 = vadd.f32 %v1497_v38, %v1373_v48  ;;  %v1566_v52 = vsel %vm234_vm0, %v1557_v50, 0.0  ;;  %v1376_v56 = vadd.f32 %v2021_v51, %v1229_v49  ;;  %v1560_v46 = vmul.f32 %v1521_v43, %v1521_v43  ;;  %v1507_v4 = vpop.f32.mrf.mxu0 }
 0x118   : > { %v1360_v0 = vpop.f32.mrf.mxu1  ;;  %v1567_v1 = vadd.f32 %v1566_v52, %v1565_v40  ;;  %v1538_v44 = vadd.f32 %v1537_v54, %v1536_v42  ;;  %v1541_v7 = vsel %vm234_vm0, %v1521_v43, 0.0 }
 0x119   : > { %1528 = vst.msk [vmem:[%s2291_s18 + $0x20] sm:$0xff] %vm234_vm0, %v1520_v53  ;;  %v1539_v59 = vsel %vm234_vm0, %v1520_v53, 0.0  ;;  %v1559_v61 = vmul.f32 %v1520_v53, %v1520_v53  ;;  %v1523_v2 = vadd.f32 %v2035_v55, %v1376_v56  ;;  %v1375_v63 = vadd.f32 %v1360_v0, %v1228_v57 }
 0x11a   : > { %v1540_v3 = vadd.f32 %v1539_v59, %v1538_v44  ;;  %v1569_v5 = vadd.f32 %v1568_v58, %v1567_v1  ;;  %v1572_v62 = vsel %vm234_vm0, %v1560_v46, 0.0 }
 0x11b   : > { %v1570_v15 = vsel %vm234_vm0, %v1559_v61, 0.0  ;;  %1531 = vst.msk [vmem:[%s2291_s18 + $0x38] sm:$0xff] %vm234_vm0, %v1523_v2  ;;  %v1522_v9 = vadd.f32 %v1507_v4, %v1375_v63  ;;  %v1562_v6 = vmul.f32 %v1523_v2, %v1523_v2  ;;  %v1545_v10 = vsel %vm234_vm0, %v1523_v2, 0.0 }
 0x11c   : > { %v1571_v16 = vadd.f32 %v1570_v15, %v1569_v5  ;;  %v1542_v60 = vadd.f32 %v1541_v7, %v1540_v3 }
 0x11d   : > { %1530 = vst.msk [vmem:[%s2291_s18 + $0x30] sm:$0xff] %vm234_vm0, %v1522_v9  ;;  %v1543_v17 = vsel %vm234_vm0, %v1522_v9, 0.0  ;;  %v1561_v8 = vmul.f32 %v1522_v9, %v1522_v9  ;;  %v1576_v21 = vsel %vm234_vm0, %v1562_v6, 0.0 }
 0x11e   : > { %v1544_v18 = vadd.f32 %v1543_v17, %v1542_v60  ;;  %v1573_v19 = vadd.f32 %v1572_v62, %v1571_v16 }
 0x11f   : > { %v1574_v11 = vsel %vm234_vm0, %v1561_v8, 0.0 }
 0x120   : > { %v1546_v13 = vadd.f32 %v1545_v10, %v1544_v18  ;;  %v1575_v20 = vadd.f32 %v1574_v11, %v1573_v19 }
 0x122   : > { %v1547_v22 = vrot.slane %v1546_v13, 4  ;;  %v1577_v23 = vadd.f32 %v1576_v21, %v1575_v20 }
 0x124   : > { %v1548_v24 = vadd.f32 %v1547_v22, %v1546_v13  ;;  %v1578_v25 = vrot.slane %v1577_v23, 4 }
 0x126   : > { %v1549_v26 = vrot.slane %v1548_v24, 2  ;;  %v1579_v27 = vadd.f32 %v1578_v25, %v1577_v23 }
 0x128   : > { %v1550_v28 = vadd.f32 %v1549_v26, %v1548_v24  ;;  %v1580_v30 = vrot.slane %v1579_v27, 2 }
 0x12a   : > { %v1551_v31 = vrot.slane %v1550_v28, 1  ;;  %v1581_v32 = vadd.f32 %v1580_v30, %v1579_v27 }
 0x12c   : > { %v1552_v33 = vadd.f32 %v1551_v31, %v1550_v28  ;;  %v1582_v12 = vrot.slane %v1581_v32, 1 }
 0x12e   : > { %1554 = vst.msk [vmem:[%s211_s21] sm:$0x1] %vm1553_vm1, %v1552_v33  ;;  %v1583_v29 = vadd.f32 %v1582_v12, %v1581_v32 }
 0x130   : > { %1584 = vst.msk [vmem:[%s214_s24] sm:$0x1] %vm1553_vm1, %v1583_v29 }
 0x131 PF: > { %s15_s15 = sadd.s32 1, %s2053_s15  }
 0x132   : > { %p12_p4 = scmp.ge.s32.totalorder %s15_s15, 4  }
 0x134   :  { %14 = sbr.rel (!%p12_p4) target bundleno = 1 (0x1), region = 92 }

// kernel: a_call__.9
= control target key start
LH: loop header
LB: loop body
LE: loop exit
PB: predicated region body
PF: predicated region fallthrough
CT: control target
= control target key end

     0   :  { %s124_s0 = inlined_call_operand.vmem [shape: f32[8,128], index: 0, kind: input, shape index: {}, may-alias: {0,6}]   ;;  %s125_s1 = inlined_call_operand.vmem [shape: f32[8,128], index: 1, kind: input, shape index: {}]   ;;  %s126_s2 = inlined_call_operand.vmem [shape: f32[1,128], index: 2, kind: input, shape index: {}]   ;;  %s127_s3 = inlined_call_operand.vmem [shape: f32[1,128], index: 3, kind: input, shape index: {}]   ;;  %s128_s4 = inlined_call_operand.vmem [shape: f32[1,128], index: 4, kind: input, shape index: {}]   ;;  %s129_s5 = inlined_call_operand.vmem [shape: f32[1,128], index: 5, kind: input, shape index: {}]   ;;  %s130_s6 = inlined_call_operand.vmem [shape: f32[8,128], index: 6, kind: output, shape index: {}, may-alias: {0,6}]  }
   0x1   :  { %v23_v0 = vld [vmem:[%s124_s0] sm:$0xff] }
   0x2   :  { %v64_v1 = vld [vmem:[%s126_s2] ss:$0 sm:$0xff] }
   0x3   :  { %v65_v2 = vld [vmem:[%s127_s3] ss:$0 sm:$0xff]  ;;  %v31_v3 = vmul.f32 %v64_v1, %v23_v0 }
   0x4   :  { %v40_v4 = vld [vmem:[%s125_s1] sm:$0xff] }
   0x5   :  { %v66_v5 = vld [vmem:[%s128_s4] ss:$0 sm:$0xff]  ;;  %v39_v8 = vadd.f32 %v65_v2, %v31_v3 }
   0x6   :  { %v67_v6 = vld [vmem:[%s129_s5] ss:$0 sm:$0xff]  ;;  %v48_v7 = vmul.f32 %v66_v5, %v40_v4 }
   0x8   :  { %v56_v9 = vadd.f32 %v67_v6, %v48_v7 }
   0xa   :  { %v57_v10 = vadd.f32 %v56_v9, %v39_v8 }
   0xc   :  { %v58_v11 = vmax.f32 %v57_v10, 0.0 }
   0xe   :  { %59 = vst [vmem:[%s130_s6] sm:$0xff] %v58_v11 }

// kernel: a_call__.8
= control target key start
LH: loop header
LB: loop body
LE: loop exit
PB: predicated region body
PF: predicated region fallthrough
CT: control target
= control target key end

     0   :  { %s613_s15 = smov 0   ;;  %s676_s0 = inlined_call_operand.vmem [shape: f32[2,1,8,8,4], index: 0, kind: input, shape index: {}]   ;;  %s677_s1 = inlined_call_operand.vmem [shape: f32[1,1,4,8], index: 1, kind: input, shape index: {}]   ;;  %s678_s2 = inlined_call_operand.vmem [shape: f32[2,64,8], index: 2, kind: output, shape index: {0}]   ;;  %s679_s3 = inlined_call_operand.vmem [shape: f32[2,1,8], index: 3, kind: output, shape index: {1}]   ;;  %s680_s4 = inlined_call_operand.vmem [shape: f32[2,1,8], index: 4, kind: output, shape index: {2}]  }
   0x1 LB: > { %s525_s16 = sadd.s32 4294967295, %s586_s15   ;;  %p529_p0 = scmp.ge.s32.totalorder %s586_s15, 1  ;;  %s586_s15 = sphi %s613_s15, %s15_s15  }
   0x2   : > { %p167_p1 = scmp.lt.s32.totalorder %s586_s15, 3 }
   0x4   : > { %p168_p2 = pnand %p529_p0, %p167_p1 }
   0x5   : > { %p199_p3 = scmp.lt.s32.totalorder (!%p168_p2), %s525_s16, 1 }
   0x6   : > { %171 = sbr.rel (%p168_p2) target bundleno = 243 (0xf3), region = 28 }
   0xb   : > { %v223_v0 = vld [vmem:[%s677_s1] sm:$0xf]  ;;  %vm249_vm0 = vcmask 1043456   ;;  %s682_s16 = smov (!%p199_p3, %s525_s16), 1  ;;  %vm224_vm1 = vcmask 31744   ;;  %vm358_vm2 = vcmask 64512  }
   0xc   : > { %556 = vmatprep.subr.msk.mxu0 %vm249_vm0, %v223_v0  ;;  %570 = vmatprep.subr.msk.mxu1 %vm249_vm0, %v223_v0  ;;  %s545_s19 = sshll.u32 %s682_s16, 6  ;;  %s211_s28 = scalar_lea.vmem %s679_s3, %s682_s16  ;;  %vm388_vm3 = vcmask 57344  }
   0xd   : > { %557 = vmatpush3.msk.msra.mxu0 %vm249_vm0, %v223_v0  ;;  %571 = vmatpush3.msk.msra.mxu1 %vm249_vm0, %v223_v0  ;;  %s203_s22 = scalar_lea.vmem %s676_s0, %s545_s19  ;;  %s208_s25 = scalar_lea.vmem %s678_s2, %s545_s19 }
   0xe   : > { %v215_v1 = vld [vmem:[%s203_s22] sm:$0xff]  ;;  %v216_v2 = vld [vmem:[%s203_s22 + $0x8] sm:$0xff]  ;;  %v217_v3 = vld [vmem:[%s203_s22 + $0x10] sm:$0xff]  ;;  %s214_s5 = scalar_lea.vmem %s680_s4, %s682_s16 }
   0xf   : > { %558 = vmatprep.mubr.msk.f32.mxu0 %vm224_vm1, %v215_v1  ;;  %v219_v4 = vld [vmem:[%s203_s22 + $0x20] sm:$0xff]  ;;  %v220_v5 = vld [vmem:[%s203_s22 + $0x28] sm:$0xff]  ;;  %v221_v6 = vld [vmem:[%s203_s22 + $0x30] sm:$0xff] }
  0x10   : > { %559 = vmatmul.mubr.msk.f32.vlgmr.msra.gmra.mxu0 %vm224_vm1, %v216_v2  ;;  %564 = vmatprep.mubr.msk.f32.mxu1 %vm224_vm1, %v219_v4  ;;  %v218_v7 = vld [vmem:[%s203_s22 + $0x18] sm:$0xff] }
  0x11   : > { %561 = vmatprep.mubr.msk.f32.mxu0 %vm224_vm1, %v217_v3  ;;  %565 = vmatmul.mubr.msk.f32.vlgmr.msra.gmra.mxu1 %vm224_vm1, %v220_v5  ;;  %v222_v8 = vld [vmem:[%s203_s22 + $0x38] sm:$0xff] }
  0x12   : > { %567 = vmatprep.mubr.msk.f32.mxu1 %vm224_vm1, %v221_v6 }
  0x14   : > { %562 = vmatmul.mubr.msk.f32.gmra.mxu0 %vm224_vm1, %v218_v7 }
  0x15   : > { %568 = vmatmul.mubr.msk.f32.gmra.mxu1 %vm224_vm1, %v222_v8 }
  0xd0   : > { %v560_v9 = vpop.f32.mrf.mxu0 }
  0xd1   : > { %360 = vst.msk [vmem:[%s208_s25 + $0x8] sm:$0xff] %vm358_vm2, %v560_v9  ;;  %v566_v10 = vpop.f32.mrf.mxu1  ;;  %v391_v12 = vmul.f32 %v560_v9, %v560_v9  ;;  %v368_v17 = vsel %vm358_vm2, %v560_v9, 0.0 }
  0xd2   : > { %v319_v11 = vpop.f32.mrf.mxu0  ;;  %364 = vst.msk [vmem:[%s208_s25 + $0x28] sm:$0xff] %vm358_vm2, %v566_v10  ;;  %v395_v35 = vmul.f32 %v566_v10, %v566_v10  ;;  %v376_v39 = vsel %vm358_vm2, %v566_v10, 0.0 }
  0xd3   : > { %359 = vst.msk [vmem:[%s208_s25] sm:$0xff] %vm358_vm2, %v319_v11  ;;  %v367_v13 = vsel %vm358_vm2, %v319_v11, 0.0  ;;  %v390_v14 = vmul.f32 %v319_v11, %v319_v11  ;;  %v339_v15 = vpop.f32.mrf.mxu1  ;;  %v399_v22 = vsel %vm358_vm2, %v391_v12, 0.0 }
  0xd4   : > { %v563_v16 = vpop.f32.mrf.mxu0  ;;  %363 = vst.msk [vmem:[%s208_s25 + $0x20] sm:$0xff] %vm358_vm2, %v339_v15  ;;  %v369_v20 = vadd.f32 %v368_v17, %v367_v13  ;;  %v394_v31 = vmul.f32 %v339_v15, %v339_v15  ;;  %v374_v36 = vsel %vm358_vm2, %v339_v15, 0.0  ;;  %v407_v44 = vsel %vm358_vm2, %v395_v35, 0.0 }
  0xd5   : > { %v398_v18 = vsel %vm358_vm2, %v390_v14, 0.0  ;;  %362 = vst.msk [vmem:[%s208_s25 + $0x18] sm:$0xff] %vm358_vm2, %v563_v16  ;;  %v569_v19 = vpop.f32.mrf.mxu1  ;;  %v393_v23 = vmul.f32 %v563_v16, %v563_v16  ;;  %v372_v29 = vsel %vm358_vm2, %v563_v16, 0.0 }
  0xd6   : > { %v329_v21 = vpop.f32.mrf.mxu0  ;;  %366 = vst.msk [vmem:[%s208_s25 + $0x38] sm:$0xff] %vm358_vm2, %v569_v19  ;;  %v400_v27 = vadd.f32 %v399_v22, %v398_v18  ;;  %v405_v40 = vsel %vm358_vm2, %v394_v31, 0.0  ;;  %v397_v45 = vmul.f32 %v569_v19, %v569_v19  ;;  %v380_v49 = vsel %vm358_vm2, %v569_v19, 0.0 }
  0xd7   : > { %361 = vst.msk [vmem:[%s208_s25 + $0x10] sm:$0xff] %vm358_vm2, %v329_v21  ;;  %v370_v24 = vsel %vm358_vm2, %v329_v21, 0.0  ;;  %v392_v25 = vmul.f32 %v329_v21, %v329_v21  ;;  %v349_v26 = vpop.f32.mrf.mxu1  ;;  %v403_v34 = vsel %vm358_vm2, %v393_v23, 0.0 }
  0xd8   : > { %v371_v28 = vadd.f32 %v370_v24, %v369_v20  ;;  %365 = vst.msk [vmem:[%s208_s25 + $0x30] sm:$0xff] %vm358_vm2, %v349_v26  ;;  %v396_v41 = vmul.f32 %v349_v26, %v349_v26  ;;  %v378_v46 = vsel %vm358_vm2, %v349_v26, 0.0  ;;  %v411_v53 = vsel %vm358_vm2, %v397_v45, 0.0 }
  0xd9   : > { %v401_v30 = vsel %vm358_vm2, %v392_v25, 0.0 }
  0xda   : > { %v373_v32 = vadd.f32 %v372_v29, %v371_v28  ;;  %v402_v33 = vadd.f32 %v401_v30, %v400_v27  ;;  %v409_v50 = vsel %vm358_vm2, %v396_v41, 0.0 }
  0xdc   : > { %v404_v37 = vadd.f32 %v403_v34, %v402_v33  ;;  %v375_v38 = vadd.f32 %v374_v36, %v373_v32 }
  0xde   : > { %v406_v42 = vadd.f32 %v405_v40, %v404_v37  ;;  %v377_v43 = vadd.f32 %v376_v39, %v375_v38 }
  0xe0   : > { %v379_v47 = vadd.f32 %v378_v46, %v377_v43  ;;  %v408_v48 = vadd.f32 %v407_v44, %v406_v42 }
  0xe2   : > { %v381_v51 = vadd.f32 %v380_v49, %v379_v47  ;;  %v410_v52 = vadd.f32 %v409_v50, %v408_v48 }
  0xe4   : > { %v382_v54 = vrot.slane %v381_v51, 4  ;;  %v412_v55 = vadd.f32 %v411_v53, %v410_v52 }
  0xe6   : > { %v383_v56 = vadd.f32 %v382_v54, %v381_v51  ;;  %v413_v57 = vrot.slane %v412_v55, 4 }
  0xe8   : > { %v384_v58 = vrot.slane %v383_v56, 2  ;;  %v414_v59 = vadd.f32 %v413_v57, %v412_v55 }
  0xea   : > { %v385_v60 = vadd.f32 %v384_v58, %v383_v56  ;;  %v415_v61 = vrot.slane %v414_v59, 2 }
  0xec   : > { %v386_v62 = vrot.slane %v385_v60, 1  ;;  %v416_v63 = vadd.f32 %v415_v61, %v414_v59 }
  0xee   : > { %v387_v0 = vadd.f32 %v386_v62, %v385_v60  ;;  %v417_v1 = vrot.slane %v416_v63, 1 }
  0xf0   : > { %389 = vst.msk [vmem:[%s211_s28] sm:$0x1] %vm388_vm3, %v387_v0  ;;  %v418_v2 = vadd.f32 %v417_v1, %v416_v63 }
  0xf2   : > { %419 = vst.msk [vmem:[%s214_s5] sm:$0x1] %vm388_vm3, %v418_v2 }
  0xf3 PF: > { %s15_s15 = sadd.s32 1, %s586_s15  }
  0xf4   : > { %p12_p4 = scmp.ge.s32.totalorder %s15_s15, 4  }
  0xf6   :  { %14 = sbr.rel (!%p12_p4) target bundleno = 1 (0x1), region = 82 }

</bundles_post_ra>
